<compile_context>
chip_gen: v7x
topology: tpu7x:2x2x1
jax: 0.10.0
libtpu: 0.0.40
codegen_flags: <defaults>
</compile_context>

<pallas_src>
import functools

import jax
import jax.numpy as jnp
import numpy as np
from jax.experimental import pallas as pl
from jax.experimental.pallas import tpu as pltpu

_VMEM_LIMIT = 64 << 20  # raise scoped VMEM (v5e default is only 16 MiB)


def kv_projection_kernel(x_ref, wkv_ref, k_ref, v_ref):
    """K/V projection for one batch element: one wide GEMM, split into K and V."""
    cdt = x_ref.dtype
    inner = k_ref.shape[-1]
    kv = jnp.dot(x_ref[0], wkv_ref[...], preferred_element_type=cdt)   # (N, 2*inner)
    k_ref[0] = kv[:, :inner]
    v_ref[0] = kv[:, inner:]


def attention_kernel(xq_ref, k_ref, v_ref, wq_ref, wo_ref, bo_ref, o_ref, *,
                     heads, dim_head):
    cdt = xq_ref.dtype            # matmul operand dtype (bf16 inputs -> fast MXU path)
    xq = xq_ref[0]                # (tq, dim)  query rows of this tile

    # All-head Q projection in one wide GEMM; softmax scale already folded into Wq.
    q_all = jnp.dot(xq, wq_ref[...], preferred_element_type=cdt)       # (tq, inner)

    ctx_parts = []
    for h in range(heads):        # unrolled; static per-head slices
        lo = h * dim_head
        q_h = q_all[:, lo:lo + dim_head]                                # (tq, dh)
        k_h = k_ref[0, :, lo:lo + dim_head]                             # (N,  dh)
        v_h = v_ref[0, :, lo:lo + dim_head]                             # (N,  dh)

        # scores = q_h @ k_h^T  (contract dh of both; no explicit transpose), f32.
        s = jax.lax.dot_general(
            q_h, k_h,
            dimension_numbers=(((1,), (1,)), ((), ())),
            preferred_element_type=jnp.float32,
        )                                                               # (tq, N)

        # Numerically-stable softmax; normalization deferred past the PV matmul.
        m = jnp.max(s, axis=-1, keepdims=True)
        e = jnp.exp(s - m)
        denom = jnp.sum(e, axis=-1, keepdims=True)
        # TODO(synk): attention dropout not implemented (module default p=0.0 ->
        # identity at inference); would need pltpu.prng_seed / prng_random_bits.

        ctx = jnp.dot(e.astype(cdt), v_h, preferred_element_type=jnp.float32)
        ctx_parts.append(ctx * pl.reciprocal(denom, approx=True))       # (tq, dh) f32

    # Fused output projection: one inner-deep GEMM over all heads at once.
    ctx_all = jnp.concatenate(ctx_parts, axis=-1)                        # (tq, inner)
    out = jnp.dot(ctx_all.astype(wo_ref.dtype), wo_ref[...],
                  preferred_element_type=jnp.float32)                    # (tq, dim)
    o_ref[0] = (out + bo_ref[...].astype(jnp.float32)).astype(o_ref.dtype)


def _round_up(x, m):
    return ((x + m - 1) // m) * m


@functools.partial(jax.jit, static_argnames=("heads", "dim_head", "tq"))
def attention(x, w_qkv, w_out, b_out, *, heads, dim_head, tq=256):
    """ViT attention (project_out=True path).

    x:     (B, N, dim)
    w_qkv: (dim, 3*inner)  == to_qkv.weight.T   (head-major columns, inner = H*dh)
    w_out: (inner, dim)    == to_out[0].weight.T
    b_out: (dim,)          == to_out[0].bias
    """
    B, N, dim = x.shape
    inner = heads * dim_head
    scale = dim_head ** -0.5
    dt_size = x.dtype.itemsize

    # Fold the softmax scale into the Q projection weights (zero runtime cost).
    wq = w_qkv[:, :inner] * scale                  # (dim, inner)
    wkv = w_qkv[:, inner:]                         # (dim, 2*inner)  [K | V]
    bo2 = b_out.reshape(1, dim)

    # --- Kernel 1: K/V projection, once per batch element (no per-tile recompute). ---
    kv_flops = 2 * B * N * dim * (2 * inner)
    kv_bytes = (x.size + wkv.size + 2 * B * N * inner) * dt_size
    k, v = pl.pallas_call(
        kv_projection_kernel,
        out_shape=(jax.ShapeDtypeStruct((B, N, inner), x.dtype),
                   jax.ShapeDtypeStruct((B, N, inner), x.dtype)),
        grid_spec=pltpu.PrefetchScalarGridSpec(
            num_scalar_prefetch=0,
            grid=(B,),
            in_specs=[
                pl.BlockSpec((1, N, dim), lambda b: (b, 0, 0)),          # x rows
                pl.BlockSpec((dim, 2 * inner), lambda b: (0, 0)),        # Wkv (resident)
            ],
            out_specs=(pl.BlockSpec((1, N, inner), lambda b: (b, 0, 0)),  # K
                       pl.BlockSpec((1, N, inner), lambda b: (b, 0, 0))), # V
        ),
        compiler_params=pltpu.CompilerParams(
            dimension_semantics=("parallel",),
            vmem_limit_bytes=_VMEM_LIMIT,
        ),
        cost_estimate=pl.CostEstimate(flops=int(kv_flops), transcendentals=0,
                                      bytes_accessed=int(kv_bytes)),
    )(x, wkv)

    # --- Kernel 2: fused Q-projection + attention + output projection. ---
    # Query tile rounded to the dtype's sublane multiple (8 f32, 16 bf16, 32 int8/fp8).
    sub = {4: 8, 2: 16, 1: 32}.get(dt_size, 8)
    tq_eff = int(min(_round_up(tq, sub), _round_up(N, sub)))
    nq = pl.cdiv(N, tq_eff)
    n_pad = nq * tq_eff
    xq = jnp.pad(x, ((0, 0), (0, n_pad - N), (0, 0))) if n_pad != N else x

    attn_flops = (2 * B * n_pad * dim * inner            # Q projection
                  + 4 * B * heads * n_pad * N * dim_head  # q@k^T and e@v
                  + 2 * B * n_pad * inner * dim)          # output projection
    attn_bytes = ((xq.size + k.size + v.size + B * n_pad * dim) * dt_size
                  + (wq.size + w_out.size + bo2.size) * w_out.dtype.itemsize)

    out = pl.pallas_call(
        functools.partial(attention_kernel, heads=heads, dim_head=dim_head),
        out_shape=jax.ShapeDtypeStruct((B, n_pad, dim), x.dtype),
        grid_spec=pltpu.PrefetchScalarGridSpec(
            num_scalar_prefetch=0,
            grid=(B, nq),
            in_specs=[
                pl.BlockSpec((1, tq_eff, dim), lambda b, i: (b, i, 0)),   # query rows
                pl.BlockSpec((1, N, inner), lambda b, i: (b, 0, 0)),      # K (resident per b)
                pl.BlockSpec((1, N, inner), lambda b, i: (b, 0, 0)),      # V (resident per b)
                pl.BlockSpec((dim, inner), lambda b, i: (0, 0)),          # Wq (resident)
                pl.BlockSpec((inner, dim), lambda b, i: (0, 0)),          # Wo (resident)
                pl.BlockSpec((1, dim), lambda b, i: (0, 0)),              # out bias
            ],
            out_specs=pl.BlockSpec((1, tq_eff, dim), lambda b, i: (b, i, 0)),
        ),
        compiler_params=pltpu.CompilerParams(
            # batch & query tiles shard across TensorCores; no reduction axis needed.
            # NOTE (dim < 128, e.g. this test's dim=32): output stores are masked
            # partial vst's — production ViT dims (multiples of 128) are lane-dense.
            dimension_semantics=("parallel", "parallel"),
            vmem_limit_bytes=_VMEM_LIMIT,
        ),
        cost_estimate=pl.CostEstimate(
            flops=int(attn_flops),
            transcendentals=int(B * heads * n_pad * N),
            bytes_accessed=int(attn_bytes),
        ),
    )(xq, k, v, wq, w_out, bo2)

    return out[:, :N, :] if n_pad != N else out


def attention_ref(x, w_qkv, w_out, b_out, heads, dim_head):
    """float64 numpy reference with identical semantics to the PyTorch module."""
    x64 = np.asarray(x, np.float64)
    wqkv = np.asarray(w_qkv, np.float64)
    wo = np.asarray(w_out, np.float64)
    bo = np.asarray(b_out, np.float64)
    B, N, _ = x64.shape
    inner = heads * dim_head
    qkv = x64 @ wqkv
    q, k, v = np.split(qkv, 3, axis=-1)

    def to_heads(t):  # 'b n (h d) -> b h n d'
        return t.reshape(B, N, heads, dim_head).transpose(0, 2, 1, 3)

    q, k, v = map(to_heads, (q, k, v))
    dots = np.einsum("bhqd,bhkd->bhqk", q, k) * dim_head ** -0.5
    dots -= dots.max(axis=-1, keepdims=True)
    e = np.exp(dots)
    attn = e / e.sum(axis=-1, keepdims=True)
    ctx = np.einsum("bhqk,bhkd->bhqd", attn, v)
    ctx = ctx.transpose(0, 2, 1, 3).reshape(B, N, inner)
    return ctx @ wo + bo


if __name__ == "__main__":
    B, N, dim = 2, 8, 32             # batch=2, seq=8, hidden=32
    heads, dim_head = 8, 64          # PyTorch defaults -> inner_dim=512, project_out=True
    inner = heads * dim_head

    key = jax.random.PRNGKey(0)
    kx, kw, ko, kb = jax.random.split(key, 4)
    x = jax.random.normal(kx, (B, N, dim), dtype=jnp.float32)
    # Synthetic parameters in (in, out) order: w_qkv == to_qkv.weight.T,
    # w_out == to_out[0].weight.T, b_out == to_out[0].bias.
    w_qkv = jax.random.normal(kw, (dim, 3 * inner), jnp.float32) / dim ** 0.5
    w_out = jax.random.normal(ko, (inner, dim), jnp.float32) / inner ** 0.5
    b_out = 0.1 * jax.random.normal(kb, (dim,), dtype=jnp.float32)

    out = attention(x, w_qkv, w_out, b_out, heads=heads, dim_head=dim_head)
    out = jax.block_until_ready(out)
    assert out.shape == (B, N, dim)

    ref = attention_ref(x, w_qkv, w_out, b_out, heads, dim_head)
    err = float(np.max(np.abs(np.asarray(out, np.float64) - ref)))
    # Tolerance covers the EUP approx-reciprocal softmax denominator (exact f32 ~1e-5).
    assert err < 1e-2, err
    print("KERNEL_OK")
</pallas_src>

<mosaic_0001>
module attributes {stable_mosaic.version = 11 : i64} {
  func.func @kv_projection_kernel(%arg0: i32, %arg1: memref<1x8x32xf32, #tpu.memory_space<vmem>>, %arg2: memref<32x1024xf32, #tpu.memory_space<vmem>>, %arg3: memref<1x8x512xf32, #tpu.memory_space<vmem>>, %arg4: memref<1x8x512xf32, #tpu.memory_space<vmem>>) attributes {dimension_semantics = [#tpu.dimension_semantics<parallel>], iteration_bounds = array<i64: 2>, scalar_prefetch = 0 : i64, scratch_operands = 0 : i64, tpu.core_type = #tpu.core_type<tc>, window_params = [{transform_indices = @transform_0, window_bounds = array<i64: 1, 8, 32>}, {pipeline_mode = #tpu.pipeline_mode<synchronous>, transform_indices = @transform_1, window_bounds = array<i64: 32, 1024>}, {transform_indices = @transform_2, window_bounds = array<i64: 1, 8, 512>}, {transform_indices = @transform_3, window_bounds = array<i64: 1, 8, 512>}]} {
    %c0 = arith.constant 0 : index
    %c0_0 = arith.constant 0 : index
    %c0_1 = arith.constant 0 : index
    %0 = vector.load %arg1[%c0, %c0_0, %c0_1] : memref<1x8x32xf32, #tpu.memory_space<vmem>>, vector<1x8x32xf32>
    %1 = vector.shape_cast %0 : vector<1x8x32xf32> to vector<8x32xf32>
    %c0_2 = arith.constant 0 : index
    %c0_3 = arith.constant 0 : index
    %2 = vector.load %arg2[%c0_2, %c0_3] : memref<32x1024xf32, #tpu.memory_space<vmem>>, vector<32x1024xf32>
    %cst = arith.constant dense<0.000000e+00> : vector<8x1024xf32>
    %3 = tpu.matmul %1, %2, %cst {dimension_numbers = #tpu.dot_dimension_numbers<[1], [0], [0], [1], [0, 0, 1, 1], [], []>} : vector<8x32xf32>, vector<32x1024xf32>, vector<8x1024xf32> -> vector<8x1024xf32>
    %4 = vector.extract_strided_slice %3 {offsets = [0, 0], sizes = [8, 512], strides = [1, 1]} : vector<8x1024xf32> to vector<8x512xf32>
    %c0_4 = arith.constant 0 : index
    %c0_5 = arith.constant 0 : index
    %c0_6 = arith.constant 0 : index
    %5 = vector.load %arg3[%c0_4, %c0_5, %c0_6] : memref<1x8x512xf32, #tpu.memory_space<vmem>>, vector<1x8x512xf32>
    %6 = vector.shape_cast %5 : vector<1x8x512xf32> to vector<8x512xf32>
    %7 = vector.shape_cast %4 : vector<8x512xf32> to vector<1x8x512xf32>
    tpu.vector_store %arg3[%c0_4, %c0_5, %c0_6], %7 {strides = array<i32>} : memref<1x8x512xf32, #tpu.memory_space<vmem>>, vector<1x8x512xf32>,
    %8 = vector.extract_strided_slice %3 {offsets = [0, 512], sizes = [8, 512], strides = [1, 1]} : vector<8x1024xf32> to vector<8x512xf32>
    %c0_7 = arith.constant 0 : index
    %c0_8 = arith.constant 0 : index
    %c0_9 = arith.constant 0 : index
    %9 = vector.load %arg4[%c0_7, %c0_8, %c0_9] : memref<1x8x512xf32, #tpu.memory_space<vmem>>, vector<1x8x512xf32>
    %10 = vector.shape_cast %9 : vector<1x8x512xf32> to vector<8x512xf32>
    %11 = vector.shape_cast %8 : vector<8x512xf32> to vector<1x8x512xf32>
    tpu.vector_store %arg4[%c0_7, %c0_8, %c0_9], %11 {strides = array<i32>} : memref<1x8x512xf32, #tpu.memory_space<vmem>>, vector<1x8x512xf32>,
    return
  }
  func.func @transform_0(%arg0: i32) -> (i32, i32, i32) {
    %c0_i32 = arith.constant 0 : i32
    %c0_i32_0 = arith.constant 0 : i32
    %c0_i32_1 = arith.constant 0 : i32
    return %arg0, %c0_i32, %c0_i32_0 : i32, i32, i32
  }
  func.func @transform_1(%arg0: i32) -> (i32, i32) {
    %c0_i32 = arith.constant 0 : i32
    %c0_i32_0 = arith.constant 0 : i32
    %c0_i32_1 = arith.constant 0 : i32
    return %c0_i32, %c0_i32_0 : i32, i32
  }
  func.func @transform_2(%arg0: i32) -> (i32, i32, i32) {
    %c0_i32 = arith.constant 0 : i32
    %c0_i32_0 = arith.constant 0 : i32
    %c0_i32_1 = arith.constant 0 : i32
    return %arg0, %c0_i32, %c0_i32_0 : i32, i32, i32
  }
  func.func @transform_3(%arg0: i32) -> (i32, i32, i32) {
    %c0_i32 = arith.constant 0 : i32
    %c0_i32_0 = arith.constant 0 : i32
    %c0_i32_1 = arith.constant 0 : i32
    return %arg0, %c0_i32, %c0_i32_0 : i32, i32, i32
  }
}

module attributes {stable_mosaic.version = 11 : i64} {
  func.func @attention_kernel(%arg0: i32, %arg1: i32, %arg2: memref<1x8x32xf32, #tpu.memory_space<vmem>>, %arg3: memref<1x8x512xf32, #tpu.memory_space<vmem>>, %arg4: memref<1x8x512xf32, #tpu.memory_space<vmem>>, %arg5: memref<32x512xf32, #tpu.memory_space<vmem>>, %arg6: memref<512x32xf32, #tpu.memory_space<vmem>>, %arg7: memref<1x32xf32, #tpu.memory_space<vmem>>, %arg8: memref<1x8x32xf32, #tpu.memory_space<vmem>>) attributes {dimension_semantics = [#tpu.dimension_semantics<parallel>, #tpu.dimension_semantics<parallel>], iteration_bounds = array<i64: 2, 1>, scalar_prefetch = 0 : i64, scratch_operands = 0 : i64, tpu.core_type = #tpu.core_type<tc>, window_params = [{transform_indices = @transform_0, window_bounds = array<i64: 1, 8, 32>}, {transform_indices = @transform_1, window_bounds = array<i64: 1, 8, 512>}, {transform_indices = @transform_2, window_bounds = array<i64: 1, 8, 512>}, {pipeline_mode = #tpu.pipeline_mode<synchronous>, transform_indices = @transform_3, window_bounds = array<i64: 32, 512>}, {pipeline_mode = #tpu.pipeline_mode<synchronous>, transform_indices = @transform_4, window_bounds = array<i64: 512, 32>}, {pipeline_mode = #tpu.pipeline_mode<synchronous>, transform_indices = @transform_5, window_bounds = array<i64: 1, 32>}, {transform_indices = @transform_6, window_bounds = array<i64: 1, 8, 32>}]} {
    %c0 = arith.constant 0 : index
    %c0_0 = arith.constant 0 : index
    %c0_1 = arith.constant 0 : index
    %0 = vector.load %arg2[%c0, %c0_0, %c0_1] : memref<1x8x32xf32, #tpu.memory_space<vmem>>, vector<1x8x32xf32>
    %1 = vector.shape_cast %0 : vector<1x8x32xf32> to vector<8x32xf32>
    %c0_2 = arith.constant 0 : index
    %c0_3 = arith.constant 0 : index
    %2 = vector.load %arg5[%c0_2, %c0_3] : memref<32x512xf32, #tpu.memory_space<vmem>>, vector<32x512xf32>
    %cst = arith.constant dense<0.000000e+00> : vector<8x512xf32>
    %3 = tpu.matmul %1, %2, %cst {dimension_numbers = #tpu.dot_dimension_numbers<[1], [0], [0], [1], [0, 0, 1, 1], [], []>} : vector<8x32xf32>, vector<32x512xf32>, vector<8x512xf32> -> vector<8x512xf32>
    %4 = vector.extract_strided_slice %3 {offsets = [0, 0], sizes = [8, 64], strides = [1, 1]} : vector<8x512xf32> to vector<8x64xf32>
    %c0_4 = arith.constant 0 : index
    %c0_5 = arith.constant 0 : index
    %c0_6 = arith.constant 0 : index
    %5 = vector.load %arg3[%c0_4, %c0_5, %c0_6] : memref<1x8x512xf32, #tpu.memory_space<vmem>>, vector<1x8x64xf32>
    %6 = vector.shape_cast %5 : vector<1x8x64xf32> to vector<8x64xf32>
    %c0_7 = arith.constant 0 : index
    %c0_8 = arith.constant 0 : index
    %c0_9 = arith.constant 0 : index
    %7 = vector.load %arg4[%c0_7, %c0_8, %c0_9] : memref<1x8x512xf32, #tpu.memory_space<vmem>>, vector<1x8x64xf32>
    %8 = vector.shape_cast %7 : vector<1x8x64xf32> to vector<8x64xf32>
    %cst_10 = arith.constant dense<0.000000e+00> : vector<8x8xf32>
    %9 = tpu.matmul %4, %6, %cst_10 {dimension_numbers = #tpu.dot_dimension_numbers<[1], [1], [0], [0], [0, 0, 1, 0], [], []>} : vector<8x64xf32>, vector<8x64xf32>, vector<8x8xf32> -> vector<8x8xf32>
    %cst_11 = arith.constant dense<0xFF800000> : vector<8xf32>
    %10 = vector.multi_reduction <maximumf>, %9, %cst_11 [1] : vector<8x8xf32> to vector<8xf32>
    %11 = vector.shape_cast %10 : vector<8xf32> to vector<8x1xf32>
    %12 = vector.broadcast %11 : vector<8x1xf32> to vector<8x8xf32>
    %13 = arith.subf %9, %12 : vector<8x8xf32>
    %14 = math.exp %13 : vector<8x8xf32>
    %cst_12 = arith.constant dense<0.000000e+00> : vector<8xf32>
    %15 = vector.multi_reduction <add>, %14, %cst_12 [1] : vector<8x8xf32> to vector<8xf32>
    %16 = vector.shape_cast %15 : vector<8xf32> to vector<8x1xf32>
    %cst_13 = arith.constant dense<0.000000e+00> : vector<8x64xf32>
    %17 = tpu.matmul %14, %8, %cst_13 {dimension_numbers = #tpu.dot_dimension_numbers<[1], [0], [0], [1], [0, 0, 1, 1], [], []>} : vector<8x8xf32>, vector<8x64xf32>, vector<8x64xf32> -> vector<8x64xf32>
    %18 = tpu.reciprocal %16 {approx = true} : vector<8x1xf32> -> vector<8x1xf32>
    %19 = vector.broadcast %18 : vector<8x1xf32> to vector<8x64xf32>
    %20 = arith.mulf %17, %19 : vector<8x64xf32>
    %21 = vector.extract_strided_slice %3 {offsets = [0, 64], sizes = [8, 64], strides = [1, 1]} : vector<8x512xf32> to vector<8x64xf32>
    %c0_14 = arith.constant 0 : index
    %c0_15 = arith.constant 0 : index
    %c64 = arith.constant 64 : index
    %22 = vector.load %arg3[%c0_14, %c0_15, %c64] : memref<1x8x512xf32, #tpu.memory_space<vmem>>, vector<1x8x64xf32>
    %23 = vector.shape_cast %22 : vector<1x8x64xf32> to vector<8x64xf32>
    %c0_16 = arith.constant 0 : index
    %c0_17 = arith.constant 0 : index
    %c64_18 = arith.constant 64 : index
    %24 = vector.load %arg4[%c0_16, %c0_17, %c64_18] : memref<1x8x512xf32, #tpu.memory_space<vmem>>, vector<1x8x64xf32>
    %25 = vector.shape_cast %24 : vector<1x8x64xf32> to vector<8x64xf32>
    %cst_19 = arith.constant dense<0.000000e+00> : vector<8x8xf32>
    %26 = tpu.matmul %21, %23, %cst_19 {dimension_numbers = #tpu.dot_dimension_numbers<[1], [1], [0], [0], [0, 0, 1, 0], [], []>} : vector<8x64xf32>, vector<8x64xf32>, vector<8x8xf32> -> vector<8x8xf32>
    %cst_20 = arith.constant dense<0xFF800000> : vector<8xf32>
    %27 = vector.multi_reduction <maximumf>, %26, %cst_20 [1] : vector<8x8xf32> to vector<8xf32>
    %28 = vector.shape_cast %27 : vector<8xf32> to vector<8x1xf32>
    %29 = vector.broadcast %28 : vector<8x1xf32> to vector<8x8xf32>
    %30 = arith.subf %26, %29 : vector<8x8xf32>
    %31 = math.exp %30 : vector<8x8xf32>
    %cst_21 = arith.constant dense<0.000000e+00> : vector<8xf32>
    %32 = vector.multi_reduction <add>, %31, %cst_21 [1] : vector<8x8xf32> to vector<8xf32>
    %33 = vector.shape_cast %32 : vector<8xf32> to vector<8x1xf32>
    %cst_22 = arith.constant dense<0.000000e+00> : vector<8x64xf32>
    %34 = tpu.matmul %31, %25, %cst_22 {dimension_numbers = #tpu.dot_dimension_numbers<[1], [0], [0], [1], [0, 0, 1, 1], [], []>} : vector<8x8xf32>, vector<8x64xf32>, vector<8x64xf32> -> vector<8x64xf32>
    %35 = tpu.reciprocal %33 {approx = true} : vector<8x1xf32> -> vector<8x1xf32>
    %36 = vector.broadcast %35 : vector<8x1xf32> to vector<8x64xf32>
    %37 = arith.mulf %34, %36 : vector<8x64xf32>
    %38 = vector.extract_strided_slice %3 {offsets = [0, 128], sizes = [8, 64], strides = [1, 1]} : vector<8x512xf32> to vector<8x64xf32>
    %c0_23 = arith.constant 0 : index
    %c0_24 = arith.constant 0 : index
    %c128 = arith.constant 128 : index
    %39 = vector.load %arg3[%c0_23, %c0_24, %c128] : memref<1x8x512xf32, #tpu.memory_space<vmem>>, vector<1x8x64xf32>
    %40 = vector.shape_cast %39 : vector<1x8x64xf32> to vector<8x64xf32>
    %c0_25 = arith.constant 0 : index
    %c0_26 = arith.constant 0 : index
    %c128_27 = arith.constant 128 : index
    %41 = vector.load %arg4[%c0_25, %c0_26, %c128_27] : memref<1x8x512xf32, #tpu.memory_space<vmem>>, vector<1x8x64xf32>
    %42 = vector.shape_cast %41 : vector<1x8x64xf32> to vector<8x64xf32>
    %cst_28 = arith.constant dense<0.000000e+00> : vector<8x8xf32>
    %43 = tpu.matmul %38, %40, %cst_28 {dimension_numbers = #tpu.dot_dimension_numbers<[1], [1], [0], [0], [0, 0, 1, 0], [], []>} : vector<8x64xf32>, vector<8x64xf32>, vector<8x8xf32> -> vector<8x8xf32>
    %cst_29 = arith.constant dense<0xFF800000> : vector<8xf32>
    %44 = vector.multi_reduction <maximumf>, %43, %cst_29 [1] : vector<8x8xf32> to vector<8xf32>
    %45 = vector.shape_cast %44 : vector<8xf32> to vector<8x1xf32>
    %46 = vector.broadcast %45 : vector<8x1xf32> to vector<8x8xf32>
    %47 = arith.subf %43, %46 : vector<8x8xf32>
    %48 = math.exp %47 : vector<8x8xf32>
    %cst_30 = arith.constant dense<0.000000e+00> : vector<8xf32>
    %49 = vector.multi_reduction <add>, %48, %cst_30 [1] : vector<8x8xf32> to vector<8xf32>
    %50 = vector.shape_cast %49 : vector<8xf32> to vector<8x1xf32>
    %cst_31 = arith.constant dense<0.000000e+00> : vector<8x64xf32>
    %51 = tpu.matmul %48, %42, %cst_31 {dimension_numbers = #tpu.dot_dimension_numbers<[1], [0], [0], [1], [0, 0, 1, 1], [], []>} : vector<8x8xf32>, vector<8x64xf32>, vector<8x64xf32> -> vector<8x64xf32>
    %52 = tpu.reciprocal %50 {approx = true} : vector<8x1xf32> -> vector<8x1xf32>
    %53 = vector.broadcast %52 : vector<8x1xf32> to vector<8x64xf32>
    %54 = arith.mulf %51, %53 : vector<8x64xf32>
    %55 = vector.extract_strided_slice %3 {offsets = [0, 192], sizes = [8, 64], strides = [1, 1]} : vector<8x512xf32> to vector<8x64xf32>
    %c0_32 = arith.constant 0 : index
    %c0_33 = arith.constant 0 : index
    %c192 = arith.constant 192 : index
    %56 = vector.load %arg3[%c0_32, %c0_33, %c192] : memref<1x8x512xf32, #tpu.memory_space<vmem>>, vector<1x8x64xf32>
    %57 = vector.shape_cast %56 : vector<1x8x64xf32> to vector<8x64xf32>
    %c0_34 = arith.constant 0 : index
    %c0_35 = arith.constant 0 : index
    %c192_36 = arith.constant 192 : index
    %58 = vector.load %arg4[%c0_34, %c0_35, %c192_36] : memref<1x8x512xf32, #tpu.memory_space<vmem>>, vector<1x8x64xf32>
    %59 = vector.shape_cast %58 : vector<1x8x64xf32> to vector<8x64xf32>
    %cst_37 = arith.constant dense<0.000000e+00> : vector<8x8xf32>
    %60 = tpu.matmul %55, %57, %cst_37 {dimension_numbers = #tpu.dot_dimension_numbers<[1], [1], [0], [0], [0, 0, 1, 0], [], []>} : vector<8x64xf32>, vector<8x64xf32>, vector<8x8xf32> -> vector<8x8xf32>
    %cst_38 = arith.constant dense<0xFF800000> : vector<8xf32>
    %61 = vector.multi_reduction <maximumf>, %60, %cst_38 [1] : vector<8x8xf32> to vector<8xf32>
    %62 = vector.shape_cast %61 : vector<8xf32> to vector<8x1xf32>
    %63 = vector.broadcast %62 : vector<8x1xf32> to vector<8x8xf32>
    %64 = arith.subf %60, %63 : vector<8x8xf32>
    %65 = math.exp %64 : vector<8x8xf32>
    %cst_39 = arith.constant dense<0.000000e+00> : vector<8xf32>
    %66 = vector.multi_reduction <add>, %65, %cst_39 [1] : vector<8x8xf32> to vector<8xf32>
    %67 = vector.shape_cast %66 : vector<8xf32> to vector<8x1xf32>
    %cst_40 = arith.constant dense<0.000000e+00> : vector<8x64xf32>
    %68 = tpu.matmul %65, %59, %cst_40 {dimension_numbers = #tpu.dot_dimension_numbers<[1], [0], [0], [1], [0, 0, 1, 1], [], []>} : vector<8x8xf32>, vector<8x64xf32>, vector<8x64xf32> -> vector<8x64xf32>
    %69 = tpu.reciprocal %67 {approx = true} : vector<8x1xf32> -> vector<8x1xf32>
    %70 = vector.broadcast %69 : vector<8x1xf32> to vector<8x64xf32>
    %71 = arith.mulf %68, %70 : vector<8x64xf32>
    %72 = vector.extract_strided_slice %3 {offsets = [0, 256], sizes = [8, 64], strides = [1, 1]} : vector<8x512xf32> to vector<8x64xf32>
    %c0_41 = arith.constant 0 : index
    %c0_42 = arith.constant 0 : index
    %c256 = arith.constant 256 : index
    %73 = vector.load %arg3[%c0_41, %c0_42, %c256] : memref<1x8x512xf32, #tpu.memory_space<vmem>>, vector<1x8x64xf32>
    %74 = vector.shape_cast %73 : vector<1x8x64xf32> to vector<8x64xf32>
    %c0_43 = arith.constant 0 : index
    %c0_44 = arith.constant 0 : index
    %c256_45 = arith.constant 256 : index
    %75 = vector.load %arg4[%c0_43, %c0_44, %c256_45] : memref<1x8x512xf32, #tpu.memory_space<vmem>>, vector<1x8x64xf32>
    %76 = vector.shape_cast %75 : vector<1x8x64xf32> to vector<8x64xf32>
    %cst_46 = arith.constant dense<0.000000e+00> : vector<8x8xf32>
    %77 = tpu.matmul %72, %74, %cst_46 {dimension_numbers = #tpu.dot_dimension_numbers<[1], [1], [0], [0], [0, 0, 1, 0], [], []>} : vector<8x64xf32>, vector<8x64xf32>, vector<8x8xf32> -> vector<8x8xf32>
    %cst_47 = arith.constant dense<0xFF800000> : vector<8xf32>
    %78 = vector.multi_reduction <maximumf>, %77, %cst_47 [1] : vector<8x8xf32> to vector<8xf32>
    %79 = vector.shape_cast %78 : vector<8xf32> to vector<8x1xf32>
    %80 = vector.broadcast %79 : vector<8x1xf32> to vector<8x8xf32>
    %81 = arith.subf %77, %80 : vector<8x8xf32>
    %82 = math.exp %81 : vector<8x8xf32>
    %cst_48 = arith.constant dense<0.000000e+00> : vector<8xf32>
    %83 = vector.multi_reduction <add>, %82, %cst_48 [1] : vector<8x8xf32> to vector<8xf32>
    %84 = vector.shape_cast %83 : vector<8xf32> to vector<8x1xf32>
    %cst_49 = arith.constant dense<0.000000e+00> : vector<8x64xf32>
    %85 = tpu.matmul %82, %76, %cst_49 {dimension_numbers = #tpu.dot_dimension_numbers<[1], [0], [0], [1], [0, 0, 1, 1], [], []>} : vector<8x8xf32>, vector<8x64xf32>, vector<8x64xf32> -> vector<8x64xf32>
    %86 = tpu.reciprocal %84 {approx = true} : vector<8x1xf32> -> vector<8x1xf32>
    %87 = vector.broadcast %86 : vector<8x1xf32> to vector<8x64xf32>
    %88 = arith.mulf %85, %87 : vector<8x64xf32>
    %89 = vector.extract_strided_slice %3 {offsets = [0, 320], sizes = [8, 64], strides = [1, 1]} : vector<8x512xf32> to vector<8x64xf32>
    %c0_50 = arith.constant 0 : index
    %c0_51 = arith.constant 0 : index
    %c320 = arith.constant 320 : index
    %90 = vector.load %arg3[%c0_50, %c0_51, %c320] : memref<1x8x512xf32, #tpu.memory_space<vmem>>, vector<1x8x64xf32>
    %91 = vector.shape_cast %90 : vector<1x8x64xf32> to vector<8x64xf32>
    %c0_52 = arith.constant 0 : index
    %c0_53 = arith.constant 0 : index
    %c320_54 = arith.constant 320 : index
    %92 = vector.load %arg4[%c0_52, %c0_53, %c320_54] : memref<1x8x512xf32, #tpu.memory_space<vmem>>, vector<1x8x64xf32>
    %93 = vector.shape_cast %92 : vector<1x8x64xf32> to vector<8x64xf32>
    %cst_55 = arith.constant dense<0.000000e+00> : vector<8x8xf32>
    %94 = tpu.matmul %89, %91, %cst_55 {dimension_numbers = #tpu.dot_dimension_numbers<[1], [1], [0], [0], [0, 0, 1, 0], [], []>} : vector<8x64xf32>, vector<8x64xf32>, vector<8x8xf32> -> vector<8x8xf32>
    %cst_56 = arith.constant dense<0xFF800000> : vector<8xf32>
    %95 = vector.multi_reduction <maximumf>, %94, %cst_56 [1] : vector<8x8xf32> to vector<8xf32>
    %96 = vector.shape_cast %95 : vector<8xf32> to vector<8x1xf32>
    %97 = vector.broadcast %96 : vector<8x1xf32> to vector<8x8xf32>
    %98 = arith.subf %94, %97 : vector<8x8xf32>
    %99 = math.exp %98 : vector<8x8xf32>
    %cst_57 = arith.constant dense<0.000000e+00> : vector<8xf32>
    %100 = vector.multi_reduction <add>, %99, %cst_57 [1] : vector<8x8xf32> to vector<8xf32>
    %101 = vector.shape_cast %100 : vector<8xf32> to vector<8x1xf32>
    %cst_58 = arith.constant dense<0.000000e+00> : vector<8x64xf32>
    %102 = tpu.matmul %99, %93, %cst_58 {dimension_numbers = #tpu.dot_dimension_numbers<[1], [0], [0], [1], [0, 0, 1, 1], [], []>} : vector<8x8xf32>, vector<8x64xf32>, vector<8x64xf32> -> vector<8x64xf32>
    %103 = tpu.reciprocal %101 {approx = true} : vector<8x1xf32> -> vector<8x1xf32>
    %104 = vector.broadcast %103 : vector<8x1xf32> to vector<8x64xf32>
    %105 = arith.mulf %102, %104 : vector<8x64xf32>
    %106 = vector.extract_strided_slice %3 {offsets = [0, 384], sizes = [8, 64], strides = [1, 1]} : vector<8x512xf32> to vector<8x64xf32>
    %c0_59 = arith.constant 0 : index
    %c0_60 = arith.constant 0 : index
    %c384 = arith.constant 384 : index
    %107 = vector.load %arg3[%c0_59, %c0_60, %c384] : memref<1x8x512xf32, #tpu.memory_space<vmem>>, vector<1x8x64xf32>
    %108 = vector.shape_cast %107 : vector<1x8x64xf32> to vector<8x64xf32>
    %c0_61 = arith.constant 0 : index
    %c0_62 = arith.constant 0 : index
    %c384_63 = arith.constant 384 : index
    %109 = vector.load %arg4[%c0_61, %c0_62, %c384_63] : memref<1x8x512xf32, #tpu.memory_space<vmem>>, vector<1x8x64xf32>
    %110 = vector.shape_cast %109 : vector<1x8x64xf32> to vector<8x64xf32>
    %cst_64 = arith.constant dense<0.000000e+00> : vector<8x8xf32>
    %111 = tpu.matmul %106, %108, %cst_64 {dimension_numbers = #tpu.dot_dimension_numbers<[1], [1], [0], [0], [0, 0, 1, 0], [], []>} : vector<8x64xf32>, vector<8x64xf32>, vector<8x8xf32> -> vector<8x8xf32>
    %cst_65 = arith.constant dense<0xFF800000> : vector<8xf32>
    %112 = vector.multi_reduction <maximumf>, %111, %cst_65 [1] : vector<8x8xf32> to vector<8xf32>
    %113 = vector.shape_cast %112 : vector<8xf32> to vector<8x1xf32>
    %114 = vector.broadcast %113 : vector<8x1xf32> to vector<8x8xf32>
    %115 = arith.subf %111, %114 : vector<8x8xf32>
    %116 = math.exp %115 : vector<8x8xf32>
    %cst_66 = arith.constant dense<0.000000e+00> : vector<8xf32>
    %117 = vector.multi_reduction <add>, %116, %cst_66 [1] : vector<8x8xf32> to vector<8xf32>
    %118 = vector.shape_cast %117 : vector<8xf32> to vector<8x1xf32>
    %cst_67 = arith.constant dense<0.000000e+00> : vector<8x64xf32>
    %119 = tpu.matmul %116, %110, %cst_67 {dimension_numbers = #tpu.dot_dimension_numbers<[1], [0], [0], [1], [0, 0, 1, 1], [], []>} : vector<8x8xf32>, vector<8x64xf32>, vector<8x64xf32> -> vector<8x64xf32>
    %120 = tpu.reciprocal %118 {approx = true} : vector<8x1xf32> -> vector<8x1xf32>
    %121 = vector.broadcast %120 : vector<8x1xf32> to vector<8x64xf32>
    %122 = arith.mulf %119, %121 : vector<8x64xf32>
    %123 = vector.extract_strided_slice %3 {offsets = [0, 448], sizes = [8, 64], strides = [1, 1]} : vector<8x512xf32> to vector<8x64xf32>
    %c0_68 = arith.constant 0 : index
    %c0_69 = arith.constant 0 : index
    %c448 = arith.constant 448 : index
    %124 = vector.load %arg3[%c0_68, %c0_69, %c448] : memref<1x8x512xf32, #tpu.memory_space<vmem>>, vector<1x8x64xf32>
    %125 = vector.shape_cast %124 : vector<1x8x64xf32> to vector<8x64xf32>
    %c0_70 = arith.constant 0 : index
    %c0_71 = arith.constant 0 : index
    %c448_72 = arith.constant 448 : index
    %126 = vector.load %arg4[%c0_70, %c0_71, %c448_72] : memref<1x8x512xf32, #tpu.memory_space<vmem>>, vector<1x8x64xf32>
    %127 = vector.shape_cast %126 : vector<1x8x64xf32> to vector<8x64xf32>
    %cst_73 = arith.constant dense<0.000000e+00> : vector<8x8xf32>
    %128 = tpu.matmul %123, %125, %cst_73 {dimension_numbers = #tpu.dot_dimension_numbers<[1], [1], [0], [0], [0, 0, 1, 0], [], []>} : vector<8x64xf32>, vector<8x64xf32>, vector<8x8xf32> -> vector<8x8xf32>
    %cst_74 = arith.constant dense<0xFF800000> : vector<8xf32>
    %129 = vector.multi_reduction <maximumf>, %128, %cst_74 [1] : vector<8x8xf32> to vector<8xf32>
    %130 = vector.shape_cast %129 : vector<8xf32> to vector<8x1xf32>
    %131 = vector.broadcast %130 : vector<8x1xf32> to vector<8x8xf32>
    %132 = arith.subf %128, %131 : vector<8x8xf32>
    %133 = math.exp %132 : vector<8x8xf32>
    %cst_75 = arith.constant dense<0.000000e+00> : vector<8xf32>
    %134 = vector.multi_reduction <add>, %133, %cst_75 [1] : vector<8x8xf32> to vector<8xf32>
    %135 = vector.shape_cast %134 : vector<8xf32> to vector<8x1xf32>
    %cst_76 = arith.constant dense<0.000000e+00> : vector<8x64xf32>
    %136 = tpu.matmul %133, %127, %cst_76 {dimension_numbers = #tpu.dot_dimension_numbers<[1], [0], [0], [1], [0, 0, 1, 1], [], []>} : vector<8x8xf32>, vector<8x64xf32>, vector<8x64xf32> -> vector<8x64xf32>
    %137 = tpu.reciprocal %135 {approx = true} : vector<8x1xf32> -> vector<8x1xf32>
    %138 = vector.broadcast %137 : vector<8x1xf32> to vector<8x64xf32>
    %139 = arith.mulf %136, %138 : vector<8x64xf32>
    %140 = tpu.concatenate %20, %37, %54, %71, %88, %105, %122, %139 in 1 : vector<8x64xf32>, vector<8x64xf32>, vector<8x64xf32>, vector<8x64xf32>, vector<8x64xf32>, vector<8x64xf32>, vector<8x64xf32>, vector<8x64xf32> -> vector<8x512xf32>
    %c0_77 = arith.constant 0 : index
    %c0_78 = arith.constant 0 : index
    %141 = vector.load %arg6[%c0_77, %c0_78] : memref<512x32xf32, #tpu.memory_space<vmem>>, vector<512x32xf32>
    %cst_79 = arith.constant dense<0.000000e+00> : vector<8x32xf32>
    %142 = tpu.matmul %140, %141, %cst_79 {dimension_numbers = #tpu.dot_dimension_numbers<[1], [0], [0], [1], [0, 0, 1, 1], [], []>} : vector<8x512xf32>, vector<512x32xf32>, vector<8x32xf32> -> vector<8x32xf32>
    %c0_80 = arith.constant 0 : index
    %c0_81 = arith.constant 0 : index
    %143 = vector.load %arg7[%c0_80, %c0_81] : memref<1x32xf32, #tpu.memory_space<vmem>>, vector<1x32xf32>
    %144 = vector.broadcast %143 : vector<1x32xf32> to vector<8x32xf32>
    %145 = arith.addf %142, %144 : vector<8x32xf32>
    %c0_82 = arith.constant 0 : index
    %c0_83 = arith.constant 0 : index
    %c0_84 = arith.constant 0 : index
    %146 = vector.load %arg8[%c0_82, %c0_83, %c0_84] : memref<1x8x32xf32, #tpu.memory_space<vmem>>, vector<1x8x32xf32>
    %147 = vector.shape_cast %146 : vector<1x8x32xf32> to vector<8x32xf32>
    %148 = vector.shape_cast %145 : vector<8x32xf32> to vector<1x8x32xf32>
    tpu.vector_store %arg8[%c0_82, %c0_83, %c0_84], %148 {strides = array<i32>} : memref<1x8x32xf32, #tpu.memory_space<vmem>>, vector<1x8x32xf32>,
    return
  }
  func.func @transform_0(%arg0: i32, %arg1: i32) -> (i32, i32, i32) {
    %c0_i32 = arith.constant 0 : i32
    %c0_i32_0 = arith.constant 0 : i32
    return %arg0, %arg1, %c0_i32 : i32, i32, i32
  }
  func.func @transform_1(%arg0: i32, %arg1: i32) -> (i32, i32, i32) {
    %c0_i32 = arith.constant 0 : i32
    %c0_i32_0 = arith.constant 0 : i32
    %c0_i32_1 = arith.constant 0 : i32
    return %arg0, %c0_i32, %c0_i32_0 : i32, i32, i32
  }
  func.func @transform_2(%arg0: i32, %arg1: i32) -> (i32, i32, i32) {
    %c0_i32 = arith.constant 0 : i32
    %c0_i32_0 = arith.constant 0 : i32
    %c0_i32_1 = arith.constant 0 : i32
    return %arg0, %c0_i32, %c0_i32_0 : i32, i32, i32
  }
  func.func @transform_3(%arg0: i32, %arg1: i32) -> (i32, i32) {
    %c0_i32 = arith.constant 0 : i32
    %c0_i32_0 = arith.constant 0 : i32
    %c0_i32_1 = arith.constant 0 : i32
    return %c0_i32, %c0_i32_0 : i32, i32
  }
  func.func @transform_4(%arg0: i32, %arg1: i32) -> (i32, i32) {
    %c0_i32 = arith.constant 0 : i32
    %c0_i32_0 = arith.constant 0 : i32
    %c0_i32_1 = arith.constant 0 : i32
    return %c0_i32, %c0_i32_0 : i32, i32
  }
  func.func @transform_5(%arg0: i32, %arg1: i32) -> (i32, i32) {
    %c0_i32 = arith.constant 0 : i32
    %c0_i32_0 = arith.constant 0 : i32
    %c0_i32_1 = arith.constant 0 : i32
    return %c0_i32, %c0_i32_0 : i32, i32
  }
  func.func @transform_6(%arg0: i32, %arg1: i32) -> (i32, i32, i32) {
    %c0_i32 = arith.constant 0 : i32
    %c0_i32_0 = arith.constant 0 : i32
    return %arg0, %arg1, %c0_i32 : i32, i32, i32
  }
}

</mosaic_0001>

<bundles_post_ra>
// kernel: attention.2
= control target key start
LH: loop header
LB: loop body
LE: loop exit
PB: predicated region body
PF: predicated region fallthrough
CT: control target
= control target key end

     0   :  { %9 = vsyncpa [#allocation3], 0  ;;  %s1243_s0 = inlined_call_operand.hbm [shape: f32[2,8,32], index: 0, kind: input, shape index: {}]   ;;  %s1244_s1 = inlined_call_operand.hbm [shape: f32[32,1024], index: 1, kind: input, shape index: {}]   ;;  %s1245_s2 = inlined_call_operand.hbm [shape: f32[2,8,512], index: 2, kind: output, shape index: {0}]   ;;  %s1246_s3 = inlined_call_operand.hbm [shape: f32[2,8,512], index: 3, kind: output, shape index: {1}]  }
   0x1   :  { %11 = vsyncpa [#allocation3 + $0x1], 0 }
   0x2   :  { %12 = vsyncpa [#allocation6], 0 }
   0x3   :  { %13 = vsyncpa [#allocation4], 0 }
   0x4   :  { %15 = vsyncpa [#allocation4 + $0x1], 0 }
   0x5   :  { %16 = vsyncpa [#allocation9], 0 }
   0x6   :  { %18 = vsyncpa [#allocation9 + $0x1], 0  ;;  %s998_s12 = smov 0   ;;  %s1000_s13 = smov 0  }
   0x7   :  { %s1002_s14 = smov 0   ;;  %s1004_s15 = smov 0  }
   0x8 LB: > { %s1019_s16 = sadd.s32 4294967295, %s969_s15   ;;  %s687_s17 = sadd.s32 4294967294, %s969_s15   ;;  %s969_s15 = sphi %s1004_s15, %s1266_s15   ;;  %s965_s14 = sphi %s1002_s14, %s1265_s14   ;;  %s961_s13 = sphi %s1000_s13, %s1264_s13   ;;  %s957_s12 = sphi %s998_s12, %s1263_s12  }
   0x9   : > { %p44_p0 = scmp.ne.s32.totalorder %s961_s13, %s957_s12  ;;  %p1247_p1 = scmp.eq.s32.totalorder %s1019_s16, 0 }
   0xa   : > { %p95_p3 = scmp.eq.s32.totalorder %s687_s17, 1  ;;  %p688_p5 = scmp.ge.s32.totalorder %s969_s15, 1 }
   0xb   : > { %p1028_p4 = por %p1247_p1, %p44_p0  ;;  %p128_p7 = scmp.lt.s32.totalorder %s969_s15, 3 }
   0xc   : > { %p1033_p6 = por %p95_p3, %p44_p0  ;;  %s971_s21 = smov [#allocation5]  }
   0xd   : > { %s1250_s18 = scalar_select %p1028_p4, 1, 0 }
   0xe   : > { %s1251_s19 = scalar_select %p1033_p6, 1, 0 }
   0xf   : > { %p1038_p8 = pnand %p688_p5, %p128_p7  ;;  %s140_s22 = sshll.u32 %s971_s21, 4  ;;  %s1042_s22 = int_to_ptr.vmem [resolvable:$true] %s140_s22 }
  0x10   : > { %s1054_s24 = sadd.s32 1, %s969_s15   ;;  %s31_s25 = sadd.s32 1, %s965_s14 }
  0x11   : > { %s1252_s20 = scalar_select %p1038_p8, 1, 0 }
  0x12   : > { %p754_p9 = pneg %p1038_p8  ;;  %s28_s26 = ssub.s32 %s969_s15, %s1054_s24 }
  0x13   : > { %s809_s29 = scalar_lea.hbm %s1244_s1, 4096 }
  0x14   : > { %p1049_p11 = pnand %p754_p9, %p1247_p1  ;;  %p810_p12 = scmp.ne.s32.totalorder %s1244_s1, %s809_s29 }
  0x15   : > { %p816_p5 = scmp.lt.u32.totalorder %s809_s29, %s1244_s1 }
  0x16   : > { %p811_p13 = pneg %p1049_p11 }
  0x18   : > { %p812_p0 = pnand %p811_p13, %p810_p12 }
  0x1a   : > { %p813_p3 = pneg %p812_p0 }
  0x1c   : > { %p818_p7 = pnand %p816_p5, %p813_p3 }
  0x1e   : > { %821 = shalt.err (!%p818_p7)
}
  0x1f   : > { %s822_s7 = scalar_lea.vmem %s1042_s22, 4096  ;;  %p830_p2 = scmp.lt.s32.totalorder %s1042_s22, %s1042_s22 }
  0x20   : > { %p823_p9 = scmp.ne.s32.totalorder %s1042_s22, %s822_s7  ;;  %p831_p6 = scmp.lt.s32.totalorder %s822_s7, %s822_s7 }
  0x22   : > { %p825_p10 = pnand %p823_p9, %p811_p13  ;;  %p832_p4 = por %p831_p6, %p830_p2 }
  0x24   : > { %p826_p1 = pneg %p825_p10 }
  0x26   : > { %p833_p8 = pnand %p832_p4, %p826_p1 }
  0x28   : > { %836 = shalt.err (!%p833_p8)
}
  0x29   : > { %s972_s8 = smov 1024   ;;  %s973_s9 = smov 64  }
  0x2a   : > { %757 = dma.hbm_to_vmem [thread:$0]  (!%p1049_p11), %s1244_s1, 4096, %s1042_s22, [#allocation6], %s972_s8, %s972_s8, %s973_s9  }
  0x2b   : > { %p29_p2 = scmp.eq.s32.totalorder %s28_s26, 0  ;;  %p38_p1 = scmp.ne.s32.totalorder %s965_s14, %s961_s13 }
  0x2c   : > { %p39_p4 = scmp.eq.s32.totalorder %s969_s15, 0  ;;  %p770_p6 = scmp.lt.s32.totalorder %s969_s15, 2 }
  0x2d   : > { %s1085_s17 = scalar_select %p29_p2, %s965_s14, %s31_s25  }
  0x2e   : > { %p40_p8 = por %p39_p4, %p38_p1  ;;  %p1254_p10 = scmp.eq.s32.totalorder %s1019_s16, 1 }
  0x2f   : > { %s154_s27 = sand.u32 1, %s965_s14   ;;  %s692_s28 = sshll.u32 %s969_s15, 7 }
  0x30   : > { %p1089_p12 = por %p1254_p10, %p38_p1  ;;  %s691_s29 = sshll.u32 %s154_s27, 3 }
  0x31   : > { %s1098_s4 = scalar_lea.hbm %s1243_s0, %s692_s28  ;;  %s158_s22 = scalar_lea.vmem [#allocation2], %s691_s29 }
  0x32   : > { %s165_s25 = sshll.u32 %s158_s22, 4  ;;  %p1100_p11 = pnand %p770_p6, %p40_p8  ;;  %s1104_s25 = int_to_ptr.vmem [resolvable:$true] %s165_s25 }
  0x33   : > { %s155_s5 = scalar_lea.sflag [#allocation3], %s154_s27  ;;  %s837_s6 = scalar_lea.hbm %s1098_s4, 128 }
  0x34   : > { %p838_p13 = scmp.ne.s32.totalorder %s1098_s4, %s837_s6  ;;  %p839_p0 = pneg %p1100_p11 }
  0x35   : > { %s842_s9 = scalar_lea.hbm %s1243_s0, 256  ;;  %p843_p7 = scmp.lt.u32.totalorder %s1098_s4, %s1243_s0 }
  0x36   : > { %p840_p3 = pnand %p839_p0, %p838_p13  ;;  %p844_p9 = scmp.lt.u32.totalorder %s842_s9, %s837_s6 }
  0x37   : > { %p846_p1 = scmp.lt.u32.totalorder %s837_s6, %s1098_s4 }
  0x38   : > { %p841_p5 = pneg %p840_p3  ;;  %p845_p2 = por %p844_p9, %p843_p7 }
  0x3a   : > { %p847_p4 = por %p846_p1, %p845_p2 }
  0x3c   : > { %p848_p6 = pnand %p847_p4, %p841_p5 }
  0x3e   : > { %851 = shalt.err (!%p848_p6)
}
  0x3f   : > { %s852_s27 = scalar_lea.vmem %s1104_s25, 128  ;;  %s974_s28 = smov [#allocation2]  }
  0x40   : > { %p853_p8 = scmp.ne.s32.totalorder %s1104_s25, %s852_s27  ;;  %s857_s29 = sshll.u32 %s974_s28, 4  ;;  %s858_s29 = int_to_ptr.vmem [resolvable:$false] %s857_s29 }
  0x41   : > { %s859_s23 = scalar_lea.vmem %s858_s29, 256  ;;  %p860_p3 = scmp.lt.s32.totalorder %s1104_s25, %s858_s29 }
  0x42   : > { %p855_p10 = pnand %p853_p8, %p839_p0  ;;  %p861_p7 = scmp.lt.s32.totalorder %s859_s23, %s852_s27 }
  0x44   : > { %p856_p13 = pneg %p855_p10  ;;  %p862_p9 = por %p861_p7, %p860_p3 }
  0x46   : > { %p863_p2 = pnand %p862_p9, %p856_p13 }
  0x48   : > { %866 = shalt.err (!%p863_p2)
}
  0x49   : > { %761 = dma.hbm_to_vmem [thread:$0]  (!%p1100_p11), %s1098_s4, 128, %s1104_s25, %s155_s5  }
  0x4a   : > { %p1257_p5 = scmp.ne.s32.totalorder %s1252_s20, 0 }
  0x4b   : > { %s1134_s30 = sand.u32 (!%p1257_p5), 1, %s961_s13   ;;  %p1258_p0 = scmp.ne.s32.totalorder (!%p1257_p5), %s1250_s18, 0 }
  0x4c   : > { %174 = sbr.rel (%p1257_p5) target bundleno = 351 (0x15f), region = 28  ;;  %s694_s22 = sshll.u32 (!%p1257_p5), %s1134_s30, 3 }
  0x4d   : > { %s177_s6 = scalar_lea.sflag (!%p1257_p5), [#allocation3], %s1134_s30  ;;  %s1138_s7 = scalar_lea.vmem (!%p1257_p5), [#allocation2], %s694_s22 }
  0x53   : > { %940 = dma.done.wait (%p1258_p0), %s177_s6, 128  }
  0x54   : > { %942 = vsyncadd (%p1258_p0), %s177_s6, 4294967168  ;;  %p1259_p11 = scmp.eq.s32.totalorder %s1019_s16, 0 }
  0x56   : > { %944 = dma.done.wait (%p1259_p11), [#allocation6], 4096   ;;  %p1260_p1 = pmov %p1259_p11 }
  0x57   : > { %v975_v0 = vmov 0.0   ;;  %v214_v1 = vld [vmem:[#allocation5 + $0x8] sm:$0xff]  ;;  %v216_v3 = vld [vmem:[#allocation5 + $0x18] sm:$0xff]  ;;  %v213_v6 = vld [vmem:[#allocation5] sm:$0xff]  ;;  %vm245_vm0 = vcmask 261120   ;;  %s696_s18 = sshll.u32 %s1134_s30, 5 }
  0x58   : > { %946 = vsyncadd (%p1260_p1), [#allocation6], 4294963200  ;;  %313 = vmatprep.mubr.f32.mxu0 %v975_v0  ;;  %384 = vmatprep.mubr.f32.mxu1 %v975_v0  ;;  %v222_v2 = vld [vmem:[#allocation5 + $0x48] sm:$0xff]  ;;  %v224_v5 = vld [vmem:[#allocation5 + $0x58] sm:$0xff]  ;;  %s204_s20 = scalar_lea.vmem [#allocation7], %s696_s18  ;;  %s710_s25 = sshll.u32 %s1019_s16, 9 }
  0x59   : > { %v712_v4 = vpack.c.bf16 %v222_v2, %v214_v1  ;;  %v221_v7 = vld [vmem:[#allocation5 + $0x40] sm:$0xff]  ;;  %v720_v8 = vpack.c.bf16 %v224_v5, %v216_v3  ;;  %v215_v10 = vld [vmem:[#allocation5 + $0x10] sm:$0xff]  ;;  %v230_v12 = vld [vmem:[#allocation5 + $0x88] sm:$0xff]  ;;  %s561_s4 = sshll.u32 %s204_s20, 4  ;;  %s1168_s8 = scalar_lea.hbm %s1245_s2, %s710_s25  ;;  %s1161_s4 = int_to_ptr.vmem [resolvable:$true] %s561_s4 }
  0x5a   : > { %v714_v9 = vpack.c.bf16 %v221_v7, %v213_v6  ;;  %v223_v11 = vld [vmem:[#allocation5 + $0x50] sm:$0xff]  ;;  %v238_v14 = vld [vmem:[#allocation5 + $0xc8] sm:$0xff]  ;;  %v232_v15 = vld [vmem:[#allocation5 + $0x98] sm:$0xff]  ;;  %s542_s9 = scalar_lea.sflag [#allocation4], %s1134_s30  ;;  %s867_s10 = scalar_lea.vmem %s1161_s4, 512 }
  0x5b   : > { %713 = vmatprep.subr.bf16.mxu0 %v712_v4  ;;  %v722_v13 = vpack.c.bf16 %v223_v11, %v215_v10  ;;  %v240_v16 = vld [vmem:[#allocation5 + $0xd8] sm:$0xff]  ;;  %721 = vmatprep.subr.bf16.mxu1 %v720_v8  ;;  %v716_v17 = vpack.c.bf16 %v238_v14, %v230_v12  ;;  %v229_v19 = vld [vmem:[#allocation5 + $0x80] sm:$0xff]  ;;  %v231_v21 = vld [vmem:[#allocation5 + $0x90] sm:$0xff]  ;;  %p868_p4 = scmp.ne.s32.totalorder %s1161_s4, %s867_s10  ;;  %s976_s11 = smov [#allocation7]  }
  0x5c   : > { %715 = vmatpush1.bf16.msra.mxu0 %v714_v9  ;;  %v724_v18 = vpack.c.bf16 %v240_v16, %v232_v15  ;;  %v237_v20 = vld [vmem:[#allocation5 + $0xc0] sm:$0xff]  ;;  %v239_v23 = vld [vmem:[#allocation5 + $0xd0] sm:$0xff]  ;;  %v218_v24 = vld [vmem:[#allocation5 + $0x28] sm:$0xff]  ;;  %s871_s27 = sshll.u32 %s976_s11, 4  ;;  %s872_s27 = int_to_ptr.vmem [resolvable:$false] %s871_s27 }
  0x5d   : > { %723 = vmatpush1.bf16.msra.mxu1 %v722_v13  ;;  %v718_v22 = vpack.c.bf16 %v237_v20, %v229_v19  ;;  %717 = vmatprep.subr.bf16.mxu0 %v716_v17  ;;  %v726_v25 = vpack.c.bf16 %v239_v23, %v231_v21  ;;  %v212_v26 = vld [vmem:[%s1138_s7] sm:$0xff]  ;;  %v226_v27 = vld [vmem:[#allocation5 + $0x68] sm:$0xff]  ;;  %v217_v32 = vld [vmem:[#allocation5 + $0x20] sm:$0xff]  ;;  %p869_p6 = pnand %p868_p4, %p1089_p12  ;;  %s873_s28 = scalar_lea.vmem %s872_s27, 1024 }
  0x5e   : > { %725 = vmatprep.subr.bf16.mxu1 %v724_v18  ;;  %v220_v28 = vld [vmem:[#allocation5 + $0x38] sm:$0xff]  ;;  %v728_v30 = vpack.c.bf16 %v226_v27, %v218_v24  ;;  %v225_v33 = vld [vmem:[#allocation5 + $0x60] sm:$0xff]  ;;  %v219_v34 = vld [vmem:[#allocation5 + $0x30] sm:$0xff]  ;;  %p874_p10 = scmp.lt.s32.totalorder %s1161_s4, %s872_s27  ;;  %p875_p13 = scmp.lt.s32.totalorder %s873_s28, %s867_s10 }
  0x5f   : > { %v228_v29 = vld [vmem:[#allocation5 + $0x78] sm:$0xff]  ;;  %v730_v35 = vpack.c.bf16 %v225_v33, %v217_v32  ;;  %v227_v36 = vld [vmem:[#allocation5 + $0x70] sm:$0xff]  ;;  %v234_v37 = vld [vmem:[#allocation5 + $0xa8] sm:$0xff]  ;;  %p870_p8 = pneg %p869_p6 }
  0x60   : > { %v736_v31 = vpack.c.bf16 %v228_v29, %v220_v28  ;;  %719 = vmatpush1.bf16.msra.mxu0 %v718_v22  ;;  %v242_v38 = vld [vmem:[#allocation5 + $0xe8] sm:$0xff]  ;;  %v738_v39 = vpack.c.bf16 %v227_v36, %v219_v34  ;;  %v236_v41 = vld [vmem:[#allocation5 + $0xb8] sm:$0xff]  ;;  %v233_v43 = vld [vmem:[#allocation5 + $0xa0] sm:$0xff]  ;;  %p876_p3 = por %p875_p13, %p874_p10 }
  0x61   : > { %727 = vmatpush1.bf16.msra.mxu1 %v726_v25  ;;  %729 = vmatprep.subr.bf16.mxu0 %v728_v30  ;;  %v732_v40 = vpack.c.bf16 %v242_v38, %v234_v37  ;;  %v244_v42 = vld [vmem:[#allocation5 + $0xf8] sm:$0xff]  ;;  %v241_v45 = vld [vmem:[#allocation5 + $0xe0] sm:$0xff]  ;;  %v235_v46 = vld [vmem:[#allocation5 + $0xb0] sm:$0xff] }
  0x62   : > { %737 = vmatprep.subr.bf16.mxu1 %v736_v31  ;;  %v740_v44 = vpack.c.bf16 %v244_v42, %v236_v41  ;;  %v243_v47 = vld [vmem:[#allocation5 + $0xf0] sm:$0xff]  ;;  %v734_v48 = vpack.c.bf16 %v241_v45, %v233_v43  ;;  %p877_p7 = pnand %p876_p3, %p870_p8 }
  0x63   : > { %698 = vmatmul.mubr.msk.f32.vlgmr.msra.gmra.mrb[0].mxu0 %vm245_vm0, %v212_v26  ;;  %v742_v49 = vpack.c.bf16 %v243_v47, %v235_v46 }
  0x64   : > { %699 = vmatmul.mubr.msk.f32.vlgmr.msra.gmra.mrb[0].mxu1 %vm245_vm0, %v212_v26  ;;  %731 = vmatpush1.bf16.msra.mxu0 %v730_v35 }
  0x65   : > { %739 = vmatpush1.bf16.msra.mxu1 %v738_v39  ;;  %733 = vmatprep.subr.bf16.mxu0 %v732_v40 }
  0x66   : > { %741 = vmatprep.subr.bf16.mxu1 %v740_v44  ;;  %455 = vmatprep.mubr.f32.mxu0 %v975_v0 }
  0x67   : > { %526 = vmatprep.mubr.f32.mxu1 %v975_v0 }
  0x68   : > { %735 = vmatpush1.bf16.msra.mxu0 %v734_v48 }
  0x69   : > { %743 = vmatpush1.bf16.msra.mxu1 %v742_v49 }
  0x6b   : > { %700 = vmatmul.mubr.msk.f32.vlgmr.msra.gmra.mrb[2].mxu0 %vm245_vm0, %v212_v26 }
  0x6c   : > { %701 = vmatmul.mubr.msk.f32.vlgmr.msra.gmra.mrb[2].mxu1 %vm245_vm0, %v212_v26 }
 0x136   : > { %v315_v50 = vpop.f32.mrb[0].mxu0 }
 0x137   : > { %533 = vst [vmem:[%s204_s20] sm:$0xff] %v315_v50  ;;  %v386_v51 = vpop.f32.mrb[0].mxu1  ;;  %v317_v52 = vpop.f32.mrb[1].mxu0 }
 0x138   : > { %535 = vst [vmem:[%s204_s20 + $0x10] sm:$0xff] %v386_v51  ;;  %534 = vst [vmem:[%s204_s20 + $0x8] sm:$0xff] %v317_v52  ;;  %v388_v53 = vpop.f32.mrb[1].mxu1 }
 0x139   : > { %536 = vst [vmem:[%s204_s20 + $0x18] sm:$0xff] %v388_v53 }
 0x13a   : > { %880 = shalt.err (!%p877_p7)
}
 0x13b   : > { %s881_s29 = scalar_lea.hbm %s1168_s8, 512  ;;  %s885_s6 = scalar_lea.hbm %s1245_s2, 1024 }
 0x13c   : > { %p882_p9 = scmp.ne.s32.totalorder %s1168_s8, %s881_s29  ;;  %p886_p0 = scmp.lt.u32.totalorder %s1168_s8, %s1245_s2 }
 0x13d   : > { %p887_p11 = scmp.lt.u32.totalorder %s885_s6, %s881_s29  ;;  %p889_p4 = scmp.lt.u32.totalorder %s881_s29, %s1168_s8 }
 0x13e   : > { %p883_p2 = pnand %p882_p9, %p1089_p12 }
 0x13f   : > { %p888_p1 = por %p887_p11, %p886_p0 }
 0x140   : > { %p884_p5 = pneg %p883_p2 }
 0x141   : > { %p890_p6 = por %p889_p4, %p888_p1 }
 0x143   : > { %p891_p8 = pnand %p890_p6, %p884_p5 }
 0x145   : > { %894 = shalt.err (!%p891_p8)
}
 0x146   : > { %750 = dma.vmem_to_hbm [thread:$0]  (%p1089_p12), %s1161_s4, 512, %s1168_s8, %s542_s9   ;;  %v457_v54 = vpop.f32.mrb[2].mxu0  ;;  %v528_v55 = vpop.f32.mrb[2].mxu1 }
 0x147   : > { %s211_s26 = scalar_lea.vmem [#allocation8], %s696_s18  ;;  %v459_v56 = vpop.f32.mrb[3].mxu0  ;;  %s1201_s27 = scalar_lea.hbm %s1246_s3, %s710_s25  ;;  %v530_v57 = vpop.f32.mrb[3].mxu1 }
 0x148   : > { %s575_s5 = sshll.u32 %s211_s26, 4  ;;  %537 = vst [vmem:[%s211_s26] sm:$0xff] %v457_v54  ;;  %539 = vst [vmem:[%s211_s26 + $0x10] sm:$0xff] %v528_v55  ;;  %s547_s18 = scalar_lea.sflag [#allocation9], %s1134_s30  ;;  %s1194_s5 = int_to_ptr.vmem [resolvable:$true] %s575_s5 }
 0x149   : > { %538 = vst [vmem:[%s211_s26 + $0x8] sm:$0xff] %v459_v56  ;;  %540 = vst [vmem:[%s211_s26 + $0x18] sm:$0xff] %v530_v57  ;;  %s895_s4 = scalar_lea.vmem %s1194_s5, 512  ;;  %s977_s8 = smov [#allocation8]  }
 0x14a   : > { %p896_p10 = scmp.ne.s32.totalorder %s1194_s5, %s895_s4  ;;  %s899_s9 = sshll.u32 %s977_s8, 4  ;;  %s900_s9 = int_to_ptr.vmem [resolvable:$false] %s899_s9 }
 0x14b   : > { %s901_s28 = scalar_lea.vmem %s900_s9, 1024  ;;  %p902_p7 = scmp.lt.s32.totalorder %s1194_s5, %s900_s9 }
 0x14c   : > { %p897_p13 = pnand %p896_p10, %p1089_p12  ;;  %p903_p9 = scmp.lt.s32.totalorder %s901_s28, %s895_s4 }
 0x14e   : > { %p898_p3 = pneg %p897_p13  ;;  %p904_p2 = por %p903_p9, %p902_p7 }
 0x150   : > { %p905_p5 = pnand %p904_p2, %p898_p3 }
 0x152   : > { %908 = shalt.err (!%p905_p5)
}
 0x153   : > { %s909_s16 = scalar_lea.hbm %s1201_s27, 512  ;;  %s913_s29 = scalar_lea.hbm %s1246_s3, 1024 }
 0x154   : > { %p910_p0 = scmp.ne.s32.totalorder %s1201_s27, %s909_s16  ;;  %p914_p4 = scmp.lt.u32.totalorder %s1201_s27, %s1246_s3 }
 0x155   : > { %p915_p6 = scmp.lt.u32.totalorder %s913_s29, %s909_s16  ;;  %p917_p10 = scmp.lt.u32.totalorder %s909_s16, %s1201_s27 }
 0x156   : > { %p911_p11 = pnand %p910_p0, %p1089_p12 }
 0x157   : > { %p916_p8 = por %p915_p6, %p914_p4 }
 0x158   : > { %p912_p1 = pneg %p911_p11 }
 0x159   : > { %p918_p13 = por %p917_p10, %p916_p8 }
 0x15b   : > { %p919_p3 = pnand %p918_p13, %p912_p1 }
 0x15d   : > { %922 = shalt.err (!%p919_p3)
}
 0x15e   : > { %751 = dma.vmem_to_hbm [thread:$0]  (%p1089_p12), %s1194_s5, 512, %s1201_s27, %s547_s18  }
 0x15f PF: > { %s587_s6 = sand.u32 1, %s957_s12   ;;  %p1261_p7 = scmp.ne.s32.totalorder %s1251_s19, 0 }
 0x160   : > { %p1262_p9 = scmp.ge.s32.totalorder %s969_s15, 2  ;;  %s588_s7 = scalar_lea.sflag [#allocation4], %s587_s6 }
 0x162   : > { %p763_p2 = pnand %p1262_p9, %p1261_p7 }
 0x164   : > { %948 = dma.done.wait (!%p763_p2), %s588_s7, 512  }
 0x165   : > { %950 = vsyncadd (!%p763_p2), %s588_s7, 4294966784  ;;  %s597_s20 = scalar_lea.sflag [#allocation9], %s587_s6 }
 0x166   : > { %952 = dma.done.wait (!%p763_p2), %s597_s20, 512  }
 0x167   : > { %954 = vsyncadd (!%p763_p2), %s597_s20, 4294966784  ;;  %p21_p12 = scmp.ge.s32.totalorder %s1054_s24, 4   ;;  %s1263_s12 = smov %s961_s13 }
 0x168   : > { %s1264_s13 = smov %s965_s14  ;;  %s1265_s14 = smov %s1085_s17 }
 0x169   : > { %s1266_s15 = smov %s1054_s24  ;;  %23 = sbr.rel (!%p21_p12) target bundleno = 8 (0x8), region = 94 }
 0x170   :  { %602 = vsyncpa [#allocation3], 1 }
 0x171   :  { %604 = vsyncpa [#allocation3 + $0x1], 1 }
 0x172   :  { %605 = vsyncpa [#allocation6], 1 }
 0x173   :  { %606 = vsyncpa [#allocation4], 1 }
 0x174   :  { %608 = vsyncpa [#allocation4 + $0x1], 1 }
 0x175   :  { %609 = vsyncpa [#allocation9], 1 }
 0x176   :  { %611 = vsyncpa [#allocation9 + $0x1], 1 }

// kernel: attention.3
= control target key start
LH: loop header
LB: loop body
LE: loop exit
PB: predicated region body
PF: predicated region fallthrough
CT: control target
= control target key end

     0   :  { %s3538_s0 = inlined_call_operand.hbm [shape: f32[2,8,32], index: 0, kind: input, shape index: {}]   ;;  %s3539_s1 = inlined_call_operand.hbm [shape: f32[2,8,512], index: 1, kind: input, shape index: {}]   ;;  %s3540_s2 = inlined_call_operand.hbm [shape: f32[2,8,512], index: 2, kind: input, shape index: {}]   ;;  %s3541_s3 = inlined_call_operand.hbm [shape: f32[32,512], index: 3, kind: input, shape index: {}]   ;;  %s3542_s4 = inlined_call_operand.hbm [shape: f32[512,32], index: 4, kind: input, shape index: {}]   ;;  %s3543_s5 = inlined_call_operand.hbm [shape: f32[1,32], index: 5, kind: input, shape index: {}]   ;;  %s3544_s6 = inlined_call_operand.hbm [shape: f32[2,8,32], index: 6, kind: output, shape index: {}]  }
   0x1   :  { %3567 = sst [smem:[#allocation27_spill]] %s3539_s1 }
   0x2   :  { %3568 = sst [smem:[#allocation28_spill]] %s3541_s3 }
   0x3   :  { %3569 = sst [smem:[#allocation29_spill]] %s3544_s6 }
   0x4   :  { %11 = vsyncpa [#allocation3], 0 }
   0x5   :  { %13 = vsyncpa [#allocation3 + $0x1], 0 }
   0x6   :  { %14 = vsyncpa [#allocation6], 0 }
   0x7   :  { %16 = vsyncpa [#allocation6 + $0x1], 0 }
   0x8   :  { %17 = vsyncpa [#allocation9], 0 }
   0x9   :  { %18 = vsyncpa [#allocation12], 0 }
   0xa   :  { %19 = vsyncpa [#allocation4], 0 }
   0xb   :  { %21 = vsyncpa [#allocation4 + $0x1], 0  ;;  %s3064_s21 = smov 0   ;;  %s3066_s22 = smov 0  }
   0xc   :  { %s3068_s23 = smov 0   ;;  %s3070_s24 = smov 0  }
   0xd   :  { %s3072_s25 = smov 0   ;;  %s3074_s26 = smov 0  }
   0xe LB: > { %3570 = sst [smem:[#allocation19_spill]] %s2993_s21  ;;  %s3095_s27 = sadd.s32 4294967295, %s3013_s26   ;;  %s3013_s26 = sphi %s3074_s26, %s27_s26   ;;  %s3009_s25 = sphi %s3072_s25, %s3617_s25   ;;  %s3005_s24 = sphi %s3070_s24, %s3616_s24   ;;  %s3001_s23 = sphi %s3068_s23, %s3612_s23   ;;  %s2997_s22 = sphi %s3066_s22, %s3615_s22   ;;  %s2993_s21 = sphi %s3064_s21, %s3614_s21  }
   0xf   : > { %3571 = sst [smem:[#allocation20_spill]] %s3001_s23  ;;  %s2276_s28 = sadd.s32 4294967294, %s3013_s26  }
  0x10   : > { %3572 = sst [smem:[#allocation21_spill]] %s3005_s24  ;;  %p61_p0 = scmp.ne.s32.totalorder %s2997_s22, %s2993_s21 }
  0x11   : > { %3573 = sst [smem:[#allocation22_spill]] %s3013_s26  ;;  %p3545_p1 = scmp.eq.s32.totalorder %s3095_s27, 0 }
  0x12   : > { %p208_p3 = scmp.eq.s32.totalorder %s2276_s28, 1  ;;  %p2277_p5 = scmp.ge.s32.totalorder %s3013_s26, 1 }
  0x13   : > { %p3104_p4 = por %p3545_p1, %p61_p0  ;;  %p215_p7 = scmp.lt.s32.totalorder %s3013_s26, 3 }
  0x14   : > { %p3109_p6 = por %p208_p3, %p61_p0  ;;  %s3015_s8 = smov [#allocation8]  }
  0x15   : > { %s3574_s29 = scalar_select %p3104_p4, 1, 0 }
  0x16   : > { %s3575_s30 = scalar_select %p3109_p6, 1, 0 }
  0x17   : > { %p3114_p8 = pnand %p2277_p5, %p215_p7  ;;  %s227_s9 = sshll.u32 %s3015_s8, 4  ;;  %s228_s9 = int_to_ptr.vmem [resolvable:$true] %s227_s9 }
  0x18   : > { %3576 = sst [smem:[#allocation23_spill]] %s3575_s30  ;;  %s39_s11 = sadd.s32 1, %s3009_s25 }
  0x19   : > { %s3577_s7 = scalar_select %p3114_p8, 1, 0 }
  0x1a   : > { %p2613_p9 = pneg %p3114_p8  ;;  %s3579_s3 = sld [smem:[#allocation28_spill]] }
  0x1c   : > { %p3123_p11 = pnand %p2613_p9, %p3545_p1 }
  0x1e   : > { %s3578_s10 = scalar_select %p3123_p11, 1, 0 }
  0x1f   : > { %p3136_p13 = pneg %p3123_p11 }
  0x20   : > { %s2745_s14 = scalar_lea.hbm %s3579_s3, 2048 }
  0x21   : > { %p2746_p12 = scmp.ne.s32.totalorder %s3579_s3, %s2745_s14  ;;  %p2752_p5 = scmp.lt.u32.totalorder %s2745_s14, %s3579_s3 }
  0x22   : > { %s3580_s17 = scalar_select %p3136_p13, 1, 0 }
  0x23   : > { %p2748_p0 = pnand %p3136_p13, %p2746_p12 }
  0x25   : > { %p2749_p3 = pneg %p2748_p0 }
  0x27   : > { %p2754_p7 = pnand %p2752_p5, %p2749_p3 }
  0x29   : > { %2757 = shalt.err (!%p2754_p7)
}
  0x2a   : > { %s2758_s20 = scalar_lea.vmem %s228_s9, 2048  ;;  %p2766_p2 = scmp.lt.s32.totalorder %s228_s9, %s228_s9 }
  0x2b   : > { %p2759_p9 = scmp.ne.s32.totalorder %s228_s9, %s2758_s20  ;;  %p2767_p6 = scmp.lt.s32.totalorder %s2758_s20, %s2758_s20 }
  0x2d   : > { %p2761_p10 = pnand %p2759_p9, %p3136_p13  ;;  %p2768_p4 = por %p2767_p6, %p2766_p2 }
  0x2f   : > { %p2762_p1 = pneg %p2761_p10 }
  0x31   : > { %p2769_p8 = pnand %p2768_p4, %p2762_p1 }
  0x33   : > { %2772 = shalt.err (!%p2769_p8)
}
  0x34   : > { %s3016_s28 = smov 512   ;;  %s3017_s8 = smov 32  }
  0x35   : > { %2616 = dma.hbm_to_vmem [thread:$0]  (!%p3123_p11), %s3579_s3, 2048, %s228_s9, [#allocation9], %s3016_s28, %s3016_s28, %s3017_s8  }
  0x36   : > { %p41_p1 = scmp.ge.s32.totalorder %s39_s11, 2  ;;  %s48_s14 = sadd.s32 1, %s3001_s23 }
  0x37   : > { %p55_p2 = scmp.ne.s32.totalorder %s3001_s23, %s2997_s22  ;;  %p56_p4 = scmp.eq.s32.totalorder %s3013_s26, 0 }
  0x38   : > { %s3619_s11 = smov (%p41_p1, %s39_s11), 0  ;;  %p3582_p8 = scmp.eq.s32.totalorder %s3095_s27, 1 }
  0x39   : > { %3581 = sst [smem:[#allocation24_spill]] %s3619_s11  ;;  %p57_p6 = por %p56_p4, %p55_p2 }
  0x3a   : > { %p3160_p10 = por %p3582_p8, %p55_p2  ;;  %s43_s16 = ssub.s32 %s3009_s25, %s3619_s11 }
  0x3b   : > { %p2640_p12 = scmp.lt.s32.totalorder %s3013_s26, 2  ;;  %p46_p0 = scmp.eq.s32.totalorder %s43_s16, 0 }
  0x3c   : > { %s3583_s15 = scalar_select %p3160_p10, 1, 0 }
  0x3d   : > { %s3168_s18 = sand.u32 1, %s3001_s23   ;;  %p3170_p3 = pnand %p2640_p12, %p57_p6 }
  0x3e   : > { %3584 = sst [smem:[#allocation25_spill]] %s3583_s15  ;;  %s284_s19 = sand.u32 1, %s3013_s26  }
  0x3f   : > { %s3585_s9 = scalar_select %p3170_p3, 1, 0 }
  0x40   : > { %s3176_s20 = scalar_select %p46_p0, %s3001_s23, %s48_s14  }
  0x41   : > { %s3553_s28 = sshll.u32 %s3168_s18, 5  ;;  %s2329_s8 = sshll.u32 %s3009_s25, 9 }
  0x42   : > { %3586 = sst [smem:[#allocation26_spill]] %s3176_s20  ;;  %s3587_s1 = sld [smem:[#allocation27_spill]] }
  0x43   : > { %s288_s16 = scalar_lea.vmem [#allocation5], %s3553_s28  ;;  %s3192_s14 = scalar_lea.hbm %s3540_s2, %s2329_s8 }
  0x44   : > { %s296_s11 = sshll.u32 %s288_s16, 4  ;;  %s3194_s20 = scalar_lea.sflag [#allocation6], %s284_s19  ;;  %s3187_s11 = int_to_ptr.vmem [resolvable:$true] %s296_s11 }
  0x45   : > { %p3200_p7 = pneg %p3170_p3 }
  0x47   : > { %s3588_s12 = scalar_select %p3200_p7, 1, 0 }
  0x48   : > { %s3183_s3 = scalar_lea.hbm %s3587_s1, %s2329_s8  ;;  %s2778_s28 = scalar_lea.hbm %s3587_s1, 1024 }
  0x49   : > { %s2773_s23 = scalar_lea.hbm %s3183_s3, 512  ;;  %p2779_p2 = scmp.lt.u32.totalorder %s3183_s3, %s3587_s1 }
  0x4a   : > { %p2774_p5 = scmp.ne.s32.totalorder %s3183_s3, %s2773_s23  ;;  %p2780_p4 = scmp.lt.u32.totalorder %s2778_s28, %s2773_s23 }
  0x4b   : > { %p2782_p8 = scmp.lt.u32.totalorder %s2773_s23, %s3183_s3 }
  0x4c   : > { %p2776_p9 = pnand %p3200_p7, %p2774_p5  ;;  %p2781_p6 = por %p2780_p4, %p2779_p2 }
  0x4e   : > { %p2777_p1 = pneg %p2776_p9  ;;  %p2783_p12 = por %p2782_p8, %p2781_p6 }
  0x50   : > { %p2784_p0 = pnand %p2783_p12, %p2777_p1 }
  0x52   : > { %2787 = shalt.err (!%p2784_p0)
}
  0x53   : > { %s2788_s19 = scalar_lea.vmem %s3187_s11, 512  ;;  %s3018_s8 = smov [#allocation5]  }
  0x54   : > { %p2789_p5 = scmp.ne.s32.totalorder %s3187_s11, %s2788_s19  ;;  %s2793_s13 = sshll.u32 %s3018_s8, 4  ;;  %s2794_s13 = int_to_ptr.vmem [resolvable:$false] %s2793_s13 }
  0x55   : > { %s2795_s16 = scalar_lea.vmem %s2794_s13, 1024  ;;  %p2796_p11 = scmp.lt.s32.totalorder %s3187_s11, %s2794_s13 }
  0x56   : > { %p2791_p9 = pnand %p2789_p5, %p3200_p7  ;;  %p2797_p13 = scmp.lt.s32.totalorder %s2795_s16, %s2788_s19 }
  0x58   : > { %p2792_p10 = pneg %p2791_p9  ;;  %p2798_p2 = por %p2797_p13, %p2796_p11 }
  0x5a   : > { %p2799_p4 = pnand %p2798_p2, %p2792_p10 }
  0x5c   : > { %2802 = shalt.err (!%p2799_p4)
}
  0x5d   : > { %2629 = dma.hbm_to_vmem [thread:$0]  (!%p3170_p3), %s3183_s3, 512, %s3187_s11, %s3194_s20  }
  0x5e   : > { %s3019_s23 = smov [#allocation10]   ;;  %s2803_s8 = scalar_lea.hbm %s3542_s4, 8192 }
  0x5f   : > { %s240_s28 = sshll.u32 %s3019_s23, 4  ;;  %p2804_p11 = scmp.ne.s32.totalorder %s3542_s4, %s2803_s8  ;;  %s241_s28 = int_to_ptr.vmem [resolvable:$true] %s240_s28 }
  0x60   : > { %p3589_p13 = scmp.ne.s32.totalorder %s3580_s17, 0  ;;  %p2810_p6 = scmp.lt.u32.totalorder %s2803_s8, %s3542_s4 }
  0x62   : > { %p2806_p10 = pnand %p2804_p11, %p3589_p13 }
  0x64   : > { %p2807_p1 = pneg %p2806_p10 }
  0x66   : > { %p2812_p8 = pnand %p2810_p6, %p2807_p1 }
  0x68   : > { %2815 = shalt.err (!%p2812_p8)
}
  0x69   : > { %s2816_s3 = scalar_lea.vmem %s241_s28, 8192  ;;  %p2824_p9 = scmp.lt.s32.totalorder %s241_s28, %s241_s28 }
  0x6a   : > { %p2817_p12 = scmp.ne.s32.totalorder %s241_s28, %s2816_s3  ;;  %p2825_p2 = scmp.lt.s32.totalorder %s2816_s3, %s2816_s3 }
  0x6c   : > { %p2819_p0 = pnand %p2817_p12, %p3589_p13  ;;  %p2826_p4 = por %p2825_p2, %p2824_p9 }
  0x6e   : > { %p2820_p5 = pneg %p2819_p0 }
  0x70   : > { %p2827_p3 = pnand %p2826_p4, %p2820_p5 }
  0x72   : > { %2830 = shalt.err (!%p2827_p3)
}
  0x73   : > { %s3020_s1 = smov 128   ;;  %s3021_s11 = smov 8  }
  0x74   : > { %p3590_p11 = scmp.ne.s32.totalorder %s3578_s10, 0  ;;  %s3022_s30 = smov [#allocation11]  }
  0x75   : > { %s254_s8 = sshll.u32 %s3022_s30, 4  ;;  %s2282_s13 = sshll.u32 %s3168_s18, 3  ;;  %s255_s8 = int_to_ptr.vmem [resolvable:$true] %s254_s8 }
  0x76   : > { %2619 = dma.hbm_to_vmem [thread:$0]  (!%p3590_p11), %s3542_s4, 8192, %s241_s28, [#allocation9], %s3020_s1, %s3020_s1, %s3021_s11  }
  0x77   : > { %s2831_s3 = scalar_lea.hbm %s3543_s5, 16 }
  0x78   : > { %p2832_p3 = scmp.ne.s32.totalorder %s3543_s5, %s2831_s3  ;;  %p2838_p6 = scmp.lt.u32.totalorder %s2831_s3, %s3543_s5 }
  0x7a   : > { %p2834_p10 = pnand %p2832_p3, %p3589_p13 }
  0x7c   : > { %p2835_p1 = pneg %p2834_p10 }
  0x7e   : > { %p2840_p8 = pnand %p2838_p6, %p2835_p1 }
  0x80   : > { %2843 = shalt.err (!%p2840_p8)
}
  0x81   : > { %s2844_s28 = scalar_lea.vmem %s255_s8, 16  ;;  %s2851_s1 = scalar_lea.vmem %s255_s8, 32 }
  0x82   : > { %p2845_p12 = scmp.ne.s32.totalorder %s255_s8, %s2844_s28  ;;  %p2852_p9 = scmp.lt.s32.totalorder %s255_s8, %s255_s8 }
  0x83   : > { %p2853_p2 = scmp.lt.s32.totalorder %s2851_s1, %s2844_s28 }
  0x84   : > { %p2847_p0 = pnand %p2845_p12, %p3589_p13 }
  0x85   : > { %p2854_p4 = por %p2853_p2, %p2852_p9 }
  0x86   : > { %p2848_p5 = pneg %p2847_p0 }
  0x88   : > { %p2855_p7 = pnand %p2854_p4, %p2848_p5 }
  0x8a   : > { %2858 = shalt.err (!%p2855_p7)
}
  0x8b   : > { %2622 = dma.hbm_to_vmem [thread:$0]  (!%p3590_p11), %s3543_s5, 16, %s255_s8, [#allocation12]  }
  0x8c   : > { %s2283_s24 = sshll.u32 %s3009_s25, 7  ;;  %s269_s23 = scalar_lea.vmem [#allocation2], %s2282_s13 }
  0x8d   : > { %s3265_s11 = scalar_lea.hbm %s3538_s0, %s2283_s24  ;;  %s277_s10 = sshll.u32 %s269_s23, 4  ;;  %s3267_s10 = int_to_ptr.vmem [resolvable:$true] %s277_s10 }
  0x8e   : > { %s3591_s26 = sshll.u32 %s3168_s18, 5  ;;  %s266_s8 = scalar_lea.sflag [#allocation3], %s3168_s18 }
  0x8f   : > { %s3271_s30 = scalar_lea.vmem [#allocation7], %s3591_s26  ;;  %s2859_s16 = scalar_lea.hbm %s3265_s11, 128 }
  0x90   : > { %s315_s19 = sshll.u32 %s3271_s30, 4  ;;  %p2860_p7 = scmp.ne.s32.totalorder %s3265_s11, %s2859_s16  ;;  %s316_s19 = int_to_ptr.vmem [resolvable:$true] %s315_s19 }
  0x91   : > { %p3592_p13 = scmp.ne.s32.totalorder %s3588_s12, 0  ;;  %s2864_s1 = scalar_lea.hbm %s3538_s0, 256 }
  0x92   : > { %p2865_p10 = scmp.lt.u32.totalorder %s3265_s11, %s3538_s0  ;;  %p2866_p1 = scmp.lt.u32.totalorder %s2864_s1, %s2859_s16 }
  0x93   : > { %p2862_p11 = pnand %p2860_p7, %p3592_p13  ;;  %p2868_p8 = scmp.lt.u32.totalorder %s2859_s16, %s3265_s11 }
  0x94   : > { %p2867_p6 = por %p2866_p1, %p2865_p10 }
  0x95   : > { %p2863_p3 = pneg %p2862_p11 }
  0x96   : > { %p2869_p12 = por %p2868_p8, %p2867_p6 }
  0x98   : > { %p2870_p0 = pnand %p2869_p12, %p2863_p3 }
  0x9a   : > { %2873 = shalt.err (!%p2870_p0)
}
  0x9b   : > { %s2874_s18 = scalar_lea.vmem %s3267_s10, 128  ;;  %s3023_s21 = smov [#allocation2]  }
  0x9c   : > { %p2875_p5 = scmp.ne.s32.totalorder %s3267_s10, %s2874_s18  ;;  %s2879_s24 = sshll.u32 %s3023_s21, 4  ;;  %s2880_s24 = int_to_ptr.vmem [resolvable:$false] %s2879_s24 }
  0x9d   : > { %s2881_s17 = scalar_lea.vmem %s2880_s24, 256  ;;  %p2882_p4 = scmp.lt.s32.totalorder %s3267_s10, %s2880_s24 }
  0x9e   : > { %p2877_p9 = pnand %p2875_p5, %p3592_p13  ;;  %p2883_p7 = scmp.lt.s32.totalorder %s2881_s17, %s2874_s18 }
  0xa0   : > { %p2878_p2 = pneg %p2877_p9  ;;  %p2884_p11 = por %p2883_p7, %p2882_p4 }
  0xa2   : > { %p2885_p10 = pnand %p2884_p11, %p2878_p2 }
  0xa4   : > { %2888 = shalt.err (!%p2885_p10)
}
  0xa5   : > { %p3593_p3 = scmp.ne.s32.totalorder %s3585_s9, 0  ;;  %s2889_s15 = scalar_lea.hbm %s3192_s14, 512 }
  0xa6   : > { %p2890_p1 = scmp.ne.s32.totalorder %s3192_s14, %s2889_s15  ;;  %s2894_s16 = scalar_lea.hbm %s3540_s2, 1024 }
  0xa7   : > { %2626 = dma.hbm_to_vmem [thread:$0]  (!%p3593_p3), %s3265_s11, 128, %s3267_s10, %s266_s8  }
  0xa8   : > { %p2892_p6 = pnand %p2890_p1, %p3592_p13  ;;  %p2895_p12 = scmp.lt.u32.totalorder %s3192_s14, %s3540_s2 }
  0xa9   : > { %p2896_p0 = scmp.lt.u32.totalorder %s2894_s16, %s2889_s15  ;;  %p2898_p9 = scmp.lt.u32.totalorder %s2889_s15, %s3192_s14 }
  0xaa   : > { %p2893_p8 = pneg %p2892_p6 }
  0xab   : > { %p2897_p5 = por %p2896_p0, %p2895_p12 }
  0xad   : > { %p2899_p2 = por %p2898_p9, %p2897_p5 }
  0xaf   : > { %p2900_p4 = pnand %p2899_p2, %p2893_p8 }
  0xb1   : > { %2903 = shalt.err (!%p2900_p4)
}
  0xb2   : > { %s2904_s11 = scalar_lea.vmem %s316_s19, 512  ;;  %s3024_s10 = smov [#allocation7]  }
  0xb3   : > { %p2905_p7 = scmp.ne.s32.totalorder %s316_s19, %s2904_s11  ;;  %s2909_s30 = sshll.u32 %s3024_s10, 4  ;;  %s2910_s30 = int_to_ptr.vmem [resolvable:$false] %s2909_s30 }
  0xb4   : > { %s2911_s8 = scalar_lea.vmem %s2910_s30, 1024  ;;  %p2912_p1 = scmp.lt.s32.totalorder %s316_s19, %s2910_s30 }
  0xb5   : > { %p2907_p11 = pnand %p2905_p7, %p3592_p13  ;;  %p2913_p6 = scmp.lt.s32.totalorder %s2911_s8, %s2904_s11 }
  0xb7   : > { %p2908_p10 = pneg %p2907_p11  ;;  %p2914_p3 = por %p2913_p6, %p2912_p1 }
  0xb9   : > { %p2915_p0 = pnand %p2914_p3, %p2908_p10 }
  0xbb   : > { %2918 = shalt.err (!%p2915_p0)
}
  0xbc   : > { %p3594_p12 = scmp.ne.s32.totalorder %s3585_s9, 0  ;;  %p3595_p8 = scmp.ne.s32.totalorder %s3577_s7, 0 }
  0xbd   : > { %s3319_s12 = sand.u32 (!%p3595_p8), 1, %s2997_s22   ;;  %p3596_p13 = scmp.ne.s32.totalorder (!%p3595_p8), %s3574_s29, 0 }
  0xbe   : > { %2632 = dma.hbm_to_vmem [thread:$0]  (!%p3594_p12), %s3192_s14, 512, %s316_s19, %s3194_s20  }
  0xbf   : > { %324 = sbr.rel (%p3595_p8) target bundleno = 1513 (0x5e9), region = 44  ;;  %s2291_s1 = sshll.u32 (!%p3595_p8), %s3319_s12, 3 }
  0xc0   : > { %s327_s6 = scalar_lea.sflag (!%p3595_p8), [#allocation3], %s3319_s12  ;;  %s3325_s13 = scalar_lea.vmem (!%p3595_p8), [#allocation2], %s2291_s1 }
  0xc6   : > { %2972 = dma.done.wait (%p3596_p13), %s327_s6, 128  }
  0xc7   : > { %2974 = vsyncadd (%p3596_p13), %s327_s6, 4294967168  ;;  %s335_s7 = sand.u32 1, %s3095_s27   ;;  %s2292_s9 = sshll.u32 %s3319_s12, 5 }
  0xc8   : > { %s336_s20 = scalar_lea.sflag [#allocation6], %s335_s7  ;;  %s3333_s14 = scalar_lea.vmem [#allocation5], %s2292_s9 }
  0xc9   : > { %2976 = dma.done.wait (%p3596_p13), %s336_s20, 1024  }
  0xca   : > { %2978 = vsyncadd (%p3596_p13), %s336_s20, 4294966272  ;;  %s3339_s19 = scalar_lea.vmem [#allocation7], %s2292_s9  ;;  %p3597_p3 = scmp.eq.s32.totalorder %s3095_s27, 0 }
  0xcc   : > { %2980 = dma.done.wait (%p3597_p3), [#allocation9], 10240   ;;  %p3598_p5 = pmov %p3597_p3 }
  0xcd   : > { %p3599_p9 = pmov %p3597_p3 }
  0xce   : > { %2982 = vsyncadd (%p3598_p5), [#allocation9], 4294957056 }
  0xcf   : > { %2984 = dma.done.wait (%p3599_p9), [#allocation12], 16   ;;  %p3600_p2 = pmov %p3597_p3 }
  0xd0   : > { %v3025_v0 = vmov 0.0   ;;  %v401_v1 = vld [vmem:[#allocation8 + $0x8] sm:$0xff]  ;;  %v400_v3 = vld [vmem:[#allocation8] sm:$0xff]  ;;  %v403_v12 = vld [vmem:[#allocation8 + $0x18] sm:$0xff]  ;;  %s3026_s27 = smov 64   ;;  %vm416_vm0 = vcmask 261120  }
  0xd1   : > { %2986 = vsyncadd (%p3600_p2), [#allocation12], 4294967280  ;;  %484 = vmatprep.mubr.f32.mxu0 %v3025_v0  ;;  %555 = vmatprep.mubr.f32.mxu1 %v3025_v0  ;;  %v405_v2 = vld [vmem:[#allocation8 + $0x28] sm:$0xff]  ;;  %v404_v5 = vld [vmem:[#allocation8 + $0x20] sm:$0xff]  ;;  %vm564_vm1 = vcmask 523264   ;;  %vm3027_vm2 = vmmov 0  }
  0xd2   : > { %v2513_v4 = vpack.c.bf16 %v405_v2, %v401_v1  ;;  %v409_v6 = vld [vmem:[#allocation8 + $0x48] sm:$0xff]  ;;  %v2515_v8 = vpack.c.bf16 %v404_v5, %v400_v3  ;;  %v408_v10 = vld [vmem:[#allocation8 + $0x40] sm:$0xff]  ;;  %v407_v13 = vld [vmem:[#allocation8 + $0x38] sm:$0xff]  ;;  %vm641_vm3 = vcmask 64512   ;;  %s3601_s29 = sld [smem:[#allocation21_spill]]  ;;  %s3602_s18 = sld [smem:[#allocation25_spill]] }
  0xd3   : > { %v413_v7 = vld [vmem:[#allocation8 + $0x68] sm:$0xff]  ;;  %v412_v11 = vld [vmem:[#allocation8 + $0x60] sm:$0xff]  ;;  %v402_v14 = vld [vmem:[#allocation8 + $0x10] sm:$0xff]  ;;  %v2521_v16 = vpack.c.bf16 %v407_v13, %v403_v12  ;;  %s398_s24 = scalar_lea.vmem [#allocation13], %s2291_s1  ;;  %s3603_s26 = sld [smem:[#allocation29_spill]] }
  0xd4   : > { %v2517_v9 = vpack.c.bf16 %v413_v7, %v409_v6  ;;  %2514 = vmatprep.subr.bf16.mxu0 %v2513_v4  ;;  %v2519_v15 = vpack.c.bf16 %v412_v11, %v408_v10  ;;  %v406_v17 = vld [vmem:[#allocation8 + $0x30] sm:$0xff]  ;;  %v411_v18 = vld [vmem:[#allocation8 + $0x58] sm:$0xff]  ;;  %v562_v24 = vld [vmem:[%s3333_s14] sm:$0xff]  ;;  %s2123_s17 = sshll.u32 %s398_s24, 4  ;;  %s2109_s28 = scalar_lea.sflag [#allocation4], %s3319_s12  ;;  %s3490_s17 = int_to_ptr.vmem [resolvable:$true] %s2123_s17 }
  0xd5   : > { %2516 = vmatpush1.bf16.msra.mxu0 %v2515_v8  ;;  %v415_v19 = vld [vmem:[#allocation8 + $0x78] sm:$0xff]  ;;  %v2523_v20 = vpack.c.bf16 %v406_v17, %v402_v14  ;;  %v410_v22 = vld [vmem:[#allocation8 + $0x50] sm:$0xff]  ;;  %2522 = vmatprep.subr.bf16.mxu1 %v2521_v16  ;;  %v892_v25 = vld [vmem:[%s3333_s14 + $0x8] sm:$0xff]  ;;  %s2919_s11 = scalar_lea.vmem %s3490_s17, 128  ;;  %s3028_s10 = smov [#allocation13]  }
  0xd6   : > { %2518 = vmatprep.subr.bf16.mxu0 %v2517_v9  ;;  %v2525_v21 = vpack.c.bf16 %v415_v19, %v411_v18  ;;  %v414_v23 = vld [vmem:[#allocation8 + $0x70] sm:$0xff]  ;;  %728 = vrot.lane.b32.xlu0 %v562_v24, %s3026_s27  ;;  %v1548_v34 = vld [vmem:[%s3333_s14 + $0x18] sm:$0xff]  ;;  %v563_v35 = vld [vmem:[%s3339_s19] sm:$0xff]  ;;  %p2920_p4 = scmp.ne.s32.totalorder %s3490_s17, %s2919_s11  ;;  %s2923_s30 = sshll.u32 %s3028_s10, 4  ;;  %s2924_s30 = int_to_ptr.vmem [resolvable:$false] %s2923_s30 }
  0xd7   : > { %2524 = vmatpush1.bf16.msra.mxu1 %v2523_v20  ;;  %v2527_v26 = vpack.c.bf16 %v414_v23, %v410_v22  ;;  %1056 = vrot.lane.b32.xlu1 %v892_v25, %s3026_s27  ;;  %v399_v27 = vld [vmem:[%s3325_s13] sm:$0xff]  ;;  %v893_v11 = vld [vmem:[%s3339_s19 + $0x8] sm:$0xff]  ;;  %s2925_s8 = scalar_lea.vmem %s2924_s30, 256  ;;  %p2926_p1 = scmp.lt.s32.totalorder %s3490_s17, %s2924_s30 }
  0xd8   : > { %2526 = vmatprep.subr.bf16.mxu1 %v2525_v21  ;;  %v1220_v31 = vld [vmem:[%s3333_s14 + $0x10] sm:$0xff]  ;;  %v3423_v8 = vld [vmem:[%s3339_s19 + $0x18] sm:$0xff]  ;;  %s2326_s21 = sshll.u32 %s3601_s29, 7  ;;  %p3605_p7 = scmp.ne.s32.totalorder %s3602_s18, 0 }
  0xd9   : > { %2520 = vmatpush1.bf16.msra.mxu0 %v2519_v15  ;;  %v1221_v7 = vld [vmem:[%s3339_s19 + $0x10] sm:$0xff]  ;;  %s3604_s16 = smov %s3603_s26  ;;  %s3488_s3 = scalar_lea.hbm %s3603_s26, %s2326_s21 }
  0xda   : > { %2433 = vmatprep.subr.mxu0 %v3025_v0  ;;  %p2921_p11 = pnand %p2920_p4, %p3605_p7  ;;  %p2927_p6 = scmp.lt.s32.totalorder %s2925_s8, %s2919_s11 }
  0xdb   : > { %2528 = vmatpush1.bf16.msra.mxu1 %v2527_v26 }
  0xdc   : > { %2298 = vmatmul.mubr.msk.f32.vlgmr.msra.gmra.mrb[0].mxu0 %vm416_vm0, %v399_v27  ;;  %2438 = vmatprep.subr.mxu1 %v3025_v0  ;;  %p2922_p10 = pneg %p2921_p11  ;;  %p2928_p0 = por %p2927_p6, %p2926_p1 }
  0xdd   : > { %2435 = vmatprep.mubr.msk.f32.mxu0 %vm3027_vm2, %v3025_v0 }
  0xde   : > { %2299 = vmatmul.mubr.msk.f32.vlgmr.msra.gmra.mrb[0].mxu1 %vm416_vm0, %v399_v27  ;;  %p2929_p12 = pnand %p2928_p0, %p2922_p10 }
  0xdf   : > { %2440 = vmatprep.mubr.msk.f32.mxu1 %vm3027_vm2, %v3025_v0  ;;  %2439 = vmatpush3.msra.mxu1 %v563_v35 }
  0xe0   : > { %2448 = vmatprep.subr.mxu1 %v3025_v0 }
  0xe2   : > { %2434 = vmatpush3.xpose.msk.msra.mxu0 %vm564_vm1, %v562_v24 }
  0xe3   : > { %2443 = vmatprep.subr.mxu0 %v3025_v0 }
 0x148   : > { %v729_v28 = vpop.permute.xlu0 %728 }
 0x149   : > { %v1057_v37 = vpop.permute.xlu1 %1056 }
 0x1af   : > { %v486_v29 = vpop.f32.mrb[0].mxu0 }
 0x1b0   : > { %726 = vrot.lane.b32.xlu0 %v486_v29, %s3026_s27  ;;  %v488_v30 = vpop.f32.mrb[1].mxu0  ;;  %2436 = vmatmul.mubr.msk.f32.vlgmr.msra.gmra.mrb[2].mxu0 %vm564_vm1, %v486_v29 }
 0x1b1   : > { %1054 = vrot.lane.b32.xlu1 %v488_v30, %s3026_s27  ;;  %2444 = vmatpush3.xpose.msk.msra.mxu0 %vm564_vm1, %v729_v28  ;;  %v557_v32 = vpop.f32.mrb[0].mxu1 }
 0x1b2   : > { %2445 = vmatprep.mubr.msk.f32.mxu0 %vm3027_vm2, %v3025_v0  ;;  %2453 = vmatprep.subr.mxu0 %v3025_v0  ;;  %v559_v33 = vpop.f32.mrb[1].mxu1 }
 0x1b4   : > { %1384 = vrot.lane.b32.xlu0 %v1220_v31, %s3026_s27 }
 0x1b5   : > { %1382 = vrot.lane.b32.xlu1 %v557_v32, %s3026_s27 }
 0x1b8   : > { %1712 = vrot.lane.b32.xlu0 %v1548_v34, %s3026_s27 }
 0x1b9   : > { %1710 = vrot.lane.b32.xlu1 %v559_v33, %s3026_s27 }
 0x1bd   : > { %814 = vrot.lane.b32.xlu1 %v563_v35, %s3026_s27 }
 0x222   : > { %v727_v36 = vpop.permute.xlu0 %726 }
 0x223   : > { %2446 = vmatmul.mubr.msk.f32.vlgmr.msra.gmra.mrb[4].mxu0 %vm564_vm1, %v727_v36  ;;  %v1055_v38 = vpop.permute.xlu1 %1054 }
 0x224   : > { %2454 = vmatpush3.xpose.msk.msra.mxu0 %vm564_vm1, %v892_v25  ;;  %2455 = vmatprep.mubr.msk.f32.mxu0 %vm3027_vm2, %v3025_v0 }
 0x225   : > { %2463 = vmatprep.subr.mxu0 %v3025_v0 }
 0x226   : > { %v1385_v39 = vpop.permute.xlu0 %1384 }
 0x227   : > { %2456 = vmatmul.mubr.msk.f32.vlgmr.msra.gmra.mrb[6].mxu0 %vm564_vm1, %v488_v30  ;;  %v1383_v40 = vpop.permute.xlu1 %1382 }
 0x228   : > { %2464 = vmatpush3.xpose.msk.msra.mxu0 %vm564_vm1, %v1057_v37  ;;  %2465 = vmatprep.mubr.msk.f32.mxu0 %vm3027_vm2, %v3025_v0 }
 0x229   : > { %2473 = vmatprep.subr.mxu0 %v3025_v0 }
 0x22a   : > { %v1713_v41 = vpop.permute.xlu0 %1712 }
 0x22b   : > { %2466 = vmatmul.mubr.msk.f32.vlgmr.msra.gmra.mrb[8].mxu0 %vm564_vm1, %v1055_v38  ;;  %v1711_v42 = vpop.permute.xlu1 %1710 }
 0x22c   : > { %2474 = vmatpush3.xpose.msk.msra.mxu0 %vm564_vm1, %v1220_v31  ;;  %2475 = vmatprep.mubr.msk.f32.mxu0 %vm3027_vm2, %v3025_v0 }
 0x22d   : > { %2483 = vmatprep.subr.mxu0 %v3025_v0 }
 0x22f   : > { %2476 = vmatmul.mubr.msk.f32.vlgmr.msra.gmra.mrb[10].mxu0 %vm564_vm1, %v557_v32  ;;  %v815_v9 = vpop.permute.xlu1 %814 }
 0x230   : > { %2484 = vmatpush3.xpose.msk.msra.mxu0 %vm564_vm1, %v1385_v39  ;;  %2485 = vmatprep.mubr.msk.f32.mxu0 %vm3027_vm2, %v3025_v0 }
 0x231   : > { %2493 = vmatprep.subr.mxu0 %v3025_v0 }
 0x233   : > { %2486 = vmatmul.mubr.msk.f32.vlgmr.msra.gmra.mrb[12].mxu0 %vm564_vm1, %v1383_v40 }
 0x234   : > { %2494 = vmatpush3.xpose.msk.msra.mxu0 %vm564_vm1, %v1548_v34  ;;  %2495 = vmatprep.mubr.msk.f32.mxu0 %vm3027_vm2, %v3025_v0 }
 0x235   : > { %2503 = vmatprep.subr.mxu0 %v3025_v0 }
 0x237   : > { %2496 = vmatmul.mubr.msk.f32.vlgmr.msra.gmra.mrb[14].mxu0 %vm564_vm1, %v559_v33 }
 0x238   : > { %2504 = vmatpush3.xpose.msk.msra.mxu0 %vm564_vm1, %v1713_v41  ;;  %2505 = vmatprep.mubr.msk.f32.mxu0 %vm3027_vm2, %v3025_v0 }
 0x23b   : > { %2506 = vmatmul.mubr.msk.f32.vlgmr.msra.gmra.mrb[16].mxu0 %vm564_vm1, %v1711_v42 }
 0x283   : > { %v637_v43 = vpop.f32.mrb[2].mxu0 }
 0x284   : > { %v2437_v44 = vpop.f32.mrb[3].mxu0  ;;  %v642_v45 = vsel %vm641_vm3, %v637_v43, -inf }
 0x285   : > { %643 = vmax.xlane.f32.xlu0 %v642_v45 }
 0x2f6   : > { %v800_v46 = vpop.f32.mrb[4].mxu0 }
 0x2f7   : > { %v2447_v47 = vpop.f32.mrb[5].mxu0  ;;  %v804_v48 = vsel %vm641_vm3, %v800_v46, -inf }
 0x2f8   : > { %805 = vmax.xlane.f32.xlu1 %v804_v48 }
 0x2fa   : > { %v966_v49 = vpop.f32.mrb[6].mxu0 }
 0x2fb   : > { %v2457_v50 = vpop.f32.mrb[7].mxu0  ;;  %v970_v51 = vsel %vm641_vm3, %v966_v49, -inf }
 0x2fc   : > { %971 = vmax.xlane.f32.xlu0 %v970_v51 }
 0x2fe   : > { %v1128_v52 = vpop.f32.mrb[8].mxu0 }
 0x2ff   : > { %v2467_v53 = vpop.f32.mrb[9].mxu0  ;;  %v1132_v54 = vsel %vm641_vm3, %v1128_v52, -inf }
 0x300   : > { %1133 = vmax.xlane.f32.xlu0 %v1132_v54  ;;  %v1912_v53 = vld [vmem:[#allocation10 + $0x80] sm:$0xff]  ;;  %v1913_v54 = vld [vmem:[#allocation10 + $0x88] sm:$0xff] }
 0x302   : > { %v1294_v55 = vpop.f32.mrb[10].mxu0 }
 0x303   : > { %v2477_v56 = vpop.f32.mrb[11].mxu0  ;;  %v1298_v57 = vsel %vm641_vm3, %v1294_v55, -inf }
 0x304   : > { %1299 = vmax.xlane.f32.xlu1 %v1298_v57  ;;  %v2529_v56 = vpack.c.bf16 %v1913_v54, %v1912_v53  ;;  %v1914_v57 = vld [vmem:[#allocation10 + $0x90] sm:$0xff] }
 0x306   : > { %v1456_v58 = vpop.f32.mrb[12].mxu0  ;;  %2530 = vmatprep.subr.bf16.mxu0 %v2529_v56  ;;  %v1927_v56 = vld [vmem:[#allocation10 + $0xf8] sm:$0xff] }
 0x307   : > { %v2487_v59 = vpop.f32.mrb[13].mxu0  ;;  %v1460_v60 = vsel %vm641_vm3, %v1456_v58, -inf }
 0x308   : > { %1461 = vmax.xlane.f32.xlu0 %v1460_v60 }
 0x30a   : > { %v1622_v61 = vpop.f32.mrb[14].mxu0 }
 0x30b   : > { %v2497_v62 = vpop.f32.mrb[15].mxu0  ;;  %v1626_v63 = vsel %vm641_vm3, %v1622_v61, -inf }
 0x30c   : > { %1627 = vmax.xlane.f32.xlu1 %v1626_v63  ;;  %v1899_v62 = vld [vmem:[#allocation10 + $0x18] sm:$0xff]  ;;  %v1916_v63 = vld [vmem:[#allocation10 + $0xa0] sm:$0xff] }
 0x30e   : > { %v1784_v1 = vpop.f32.mrb[16].mxu0 }
 0x30f   : > { %v2507_v2 = vpop.f32.mrb[17].mxu0  ;;  %v1788_v3 = vsel %vm641_vm3, %v1784_v1, -inf }
 0x310   : > { %1789 = vmax.xlane.f32.xlu0 %v1788_v3 }
 0x312   : > { %v644_v4 = vpop.xlane.xlu0 %643 }
 0x313   : > { %v645_v5 = vsub.f32 %v637_v43, %v644_v4  ;;  %v1900_v4 = vld [vmem:[#allocation10 + $0x20] sm:$0xff] }
 0x315   : > { %v646_v6 = vmul.f32 1.442695, %v645_v5  ;;  %v1901_v5 = vld [vmem:[#allocation10 + $0x28] sm:$0xff] }
 0x317   : > { %2713 = vpow2.f32 %v646_v6  ;;  %v1918_v6 = vld [vmem:[#allocation10 + $0xb0] sm:$0xff] }
 0x31d   : > { %1470 = vrot.lane.b32.xlu1 %v1221_v7, %s3026_s27 }
 0x321   : > { %v3425_v10 = vpop.eup %2713  ;;  %1798 = vrot.lane.b32.xlu1 %v3423_v8, %s3026_s27 }
 0x322   : > { %2441 = vmatmul.mubr.msk.f32.vlgmr.msra.gmra.mrb[2].mxu1 %vm641_vm3, %v3425_v10 }
 0x323   : > { %2449 = vmatpush3.msra.mxu1 %v815_v9  ;;  %2450 = vmatprep.mubr.msk.f32.mxu1 %vm3027_vm2, %v3025_v0  ;;  %v1945_v9 = vld [vmem:[#allocation10 + $0x188] sm:$0xff] }
 0x324   : > { %2458 = vmatprep.subr.mxu1 %v3025_v0 }
 0x326   : > { %1142 = vrot.lane.b32.xlu0 %v893_v11, %s3026_s27 }
 0x385   : > { %v806_v12 = vpop.xlane.xlu1 %805 }
 0x386   : > { %v807_v13 = vsub.f32 %v800_v46, %v806_v12  ;;  %v1929_v12 = vld [vmem:[#allocation10 + $0x108] sm:$0xff] }
 0x388   : > { %v808_v14 = vmul.f32 1.442695, %v807_v13  ;;  %v2539_v13 = vpack.c.bf16 %v1901_v5, %v1900_v4  ;;  %v1952_v4 = vld [vmem:[#allocation10 + $0x1c0] sm:$0xff]  ;;  %v1953_v5 = vld [vmem:[#allocation10 + $0x1c8] sm:$0xff] }
 0x389   : > { %v972_v15 = vpop.xlane.xlu0 %971 }
 0x38a   : > { %2715 = vpow2.f32 %v808_v14  ;;  %v973_v16 = vsub.f32 %v966_v49, %v972_v15  ;;  %v648_v49 = vsel %vm641_vm3, %v3425_v10, 0.0  ;;  %v1902_v14 = vld [vmem:[#allocation10 + $0x30] sm:$0xff] }
 0x38c   : > { %v974_v17 = vmul.f32 1.442695, %v973_v16  ;;  %v1946_v16 = vld [vmem:[#allocation10 + $0x190] sm:$0xff] }
 0x38d   : > { %v1134_v18 = vpop.xlane.xlu0 %1133 }
 0x38e   : > { %2717 = vpow2.f32 %v974_v17  ;;  %v1135_v19 = vsub.f32 %v1128_v52, %v1134_v18  ;;  %v1903_v18 = vld [vmem:[#allocation10 + $0x38] sm:$0xff] }
 0x390   : > { %v1136_v20 = vmul.f32 1.442695, %v1135_v19  ;;  %v1920_v19 = vld [vmem:[#allocation10 + $0xc0] sm:$0xff] }
 0x391   : > { %v1300_v21 = vpop.xlane.xlu1 %1299 }
 0x392   : > { %2719 = vpow2.f32 %v1136_v20  ;;  %v1301_v23 = vsub.f32 %v1294_v55, %v1300_v21  ;;  %v1896_v55 = vld [vmem:[#allocation10] sm:$0xff]  ;;  %v1947_v20 = vld [vmem:[#allocation10 + $0x198] sm:$0xff]  ;;  %v1921_v21 = vld [vmem:[#allocation10 + $0xc8] sm:$0xff] }
 0x394   : > { %v2716_v22 = vpop.eup %2715  ;;  %v1302_v27 = vmul.f32 1.442695, %v1301_v23  ;;  %v1930_v23 = vld [vmem:[#allocation10 + $0x110] sm:$0xff] }
 0x395   : > { %2451 = vmatmul.mubr.msk.f32.vlgmr.msra.gmra.mrb[4].mxu1 %vm641_vm3, %v2716_v22  ;;  %v1462_v24 = vpop.xlane.xlu0 %1461  ;;  %v810_v25 = vsel %vm641_vm3, %v2716_v22, 0.0  ;;  %v2565_v22 = vpack.c.bf16 %v1947_v20, %v1946_v16  ;;  %v1956_v16 = vld [vmem:[#allocation10 + $0x1e0] sm:$0xff] }
 0x396   : > { %811 = vadd.xlane.f32.xlu1 %v810_v25  ;;  %2459 = vmatpush3.msra.mxu1 %v893_v11  ;;  %v1463_v28 = vsub.f32 %v1456_v58, %v1462_v24  ;;  %2721 = vpow2.f32 %v1302_v27  ;;  %v1915_v58 = vld [vmem:[#allocation10 + $0x98] sm:$0xff]  ;;  %v1928_v11 = vld [vmem:[#allocation10 + $0x100] sm:$0xff]  ;;  %v1949_v27 = vld [vmem:[#allocation10 + $0x1a8] sm:$0xff] }
 0x397   : > { %2460 = vmatprep.mubr.msk.f32.mxu1 %vm3027_vm2, %v3025_v0  ;;  %2468 = vmatprep.subr.mxu1 %v3025_v0  ;;  %v2533_v60 = vpack.c.bf16 %v1915_v58, %v1914_v57  ;;  %v2563_v15 = vpack.c.bf16 %v1929_v12, %v1928_v11  ;;  %v1931_v24 = vld [vmem:[#allocation10 + $0x118] sm:$0xff]  ;;  %v1938_v12 = vld [vmem:[#allocation10 + $0x150] sm:$0xff] }
 0x398   : > { %v2718_v26 = vpop.eup %2717  ;;  %v1464_v33 = vmul.f32 1.442695, %v1463_v28  ;;  %v2567_v25 = vpack.c.bf16 %v1931_v24, %v1930_v23  ;;  %v2543_v28 = vpack.c.bf16 %v1903_v18, %v1902_v14  ;;  %v1955_v11 = vld [vmem:[#allocation10 + $0x1d8] sm:$0xff]  ;;  %v1940_v23 = vld [vmem:[#allocation10 + $0x160] sm:$0xff]  ;;  %v1941_v24 = vld [vmem:[#allocation10 + $0x168] sm:$0xff] }
 0x399   : > { %2461 = vmatmul.mubr.msk.f32.vlgmr.msra.gmra.mrb[6].mxu1 %vm641_vm3, %v2718_v26  ;;  %v1628_v29 = vpop.xlane.xlu1 %1627  ;;  %v976_v30 = vsel %vm641_vm3, %v2718_v26, 0.0  ;;  %v1948_v26 = vld [vmem:[#allocation10 + $0x1a0] sm:$0xff] }
 0x39a   : > { %v1629_v31 = vsub.f32 %v1622_v61, %v1628_v29  ;;  %977 = vadd.xlane.f32.xlu1 %v976_v30  ;;  %2470 = vmatprep.mubr.msk.f32.mxu1 %vm3027_vm2, %v3025_v0  ;;  %v1898_v61 = vld [vmem:[#allocation10 + $0x10] sm:$0xff]  ;;  %v2569_v29 = vpack.c.bf16 %v1949_v27, %v1948_v26  ;;  %v1932_v30 = vld [vmem:[#allocation10 + $0x120] sm:$0xff] }
 0x39b   : > { %v2535_v2 = vpack.c.bf16 %v1899_v62, %v1898_v61  ;;  %v1911_v61 = vld [vmem:[#allocation10 + $0x78] sm:$0xff] }
 0x39c   : > { %v2720_v32 = vpop.eup %2719  ;;  %v1630_v34 = vmul.f32 1.442695, %v1629_v31  ;;  %v2545_v31 = vpack.c.bf16 %v1921_v21, %v1920_v19 }
 0x39d   : > { %v1790_v35 = vpop.xlane.xlu0 %1789  ;;  %v1138_v36 = vsel %vm641_vm3, %v2720_v32, 0.0  ;;  %v1471_v40 = vpop.permute.xlu1 %1470 }
 0x39e   : > { %2723 = vpow2.f32 %v1630_v34  ;;  %v1791_v37 = vsub.f32 %v1784_v1, %v1790_v35  ;;  %1139 = vadd.xlane.f32.xlu0 %v1138_v36  ;;  %v1917_v1 = vld [vmem:[#allocation10 + $0xa8] sm:$0xff]  ;;  %v1922_v35 = vld [vmem:[#allocation10 + $0xd0] sm:$0xff]  ;;  %v1923_v36 = vld [vmem:[#allocation10 + $0xd8] sm:$0xff] }
 0x39f   : > { %2725 = vpow2.f32 %v1464_v33  ;;  %v2537_v3 = vpack.c.bf16 %v1917_v1, %v1916_v63  ;;  %v1905_v33 = vld [vmem:[#allocation10 + $0x48] sm:$0xff]  ;;  %v1934_v1 = vld [vmem:[#allocation10 + $0x130] sm:$0xff] }
 0x3a0   : > { %v1792_v38 = vmul.f32 1.442695, %v1791_v37  ;;  %v2722_v41 = vpop.eup %2721  ;;  %v1933_v34 = vld [vmem:[#allocation10 + $0x128] sm:$0xff] }
 0x3a1   : > { %v1143_v39 = vpop.permute.xlu0 %1142  ;;  %v1799_v47 = vpop.permute.xlu1 %1798  ;;  %v1304_v50 = vsel %vm641_vm3, %v2722_v41, 0.0  ;;  %v2571_v37 = vpack.c.bf16 %v1933_v34, %v1932_v30  ;;  %v2587_v30 = vpack.c.bf16 %v1941_v24, %v1940_v23  ;;  %v1959_v34 = vld [vmem:[#allocation10 + $0x1f8] sm:$0xff] }
 0x3a2   : > { %2727 = vpow2.f32 %v1792_v38  ;;  %2469 = vmatpush3.msra.mxu1 %v1143_v39  ;;  %v2549_v39 = vpack.c.bf16 %v1923_v36, %v1922_v35  ;;  %v1942_v36 = vld [vmem:[#allocation10 + $0x170] sm:$0xff] }
 0x3a3   : > { %2471 = vmatmul.mubr.msk.f32.vlgmr.msra.gmra.mrb[8].mxu1 %vm641_vm3, %v2720_v32  ;;  %2478 = vmatprep.subr.mxu1 %v3025_v0  ;;  %v1904_v32 = vld [vmem:[#allocation10 + $0x40] sm:$0xff] }
 0x3a4   : > { %2479 = vmatpush3.msra.mxu1 %v1221_v7  ;;  %2480 = vmatprep.mubr.msk.f32.mxu1 %vm3027_vm2, %v3025_v0  ;;  %v1919_v7 = vld [vmem:[#allocation10 + $0xb8] sm:$0xff]  ;;  %v2547_v38 = vpack.c.bf16 %v1905_v33, %v1904_v32  ;;  %v1958_v33 = vld [vmem:[#allocation10 + $0x1f0] sm:$0xff] }
 0x3a5   : > { %2488 = vmatprep.subr.mxu1 %v3025_v0  ;;  %v2541_v17 = vpack.c.bf16 %v1919_v7, %v1918_v6  ;;  %v2577_v6 = vpack.c.bf16 %v1953_v5, %v1952_v4  ;;  %v1936_v7 = vld [vmem:[#allocation10 + $0x140] sm:$0xff]  ;;  %v2589_v35 = vpack.c.bf16 %v1959_v34, %v1958_v33 }
 0x3a7   : > { %2481 = vmatmul.mubr.msk.f32.vlgmr.msra.gmra.mrb[10].mxu1 %vm641_vm3, %v2722_v41  ;;  %v1907_v41 = vld [vmem:[#allocation10 + $0x58] sm:$0xff] }
 0x3a8   : > { %v2724_v42 = vpop.eup %2723  ;;  %2489 = vmatpush3.msra.mxu1 %v1471_v40  ;;  %2490 = vmatprep.mubr.msk.f32.mxu1 %vm3027_vm2, %v3025_v0  ;;  %v1906_v40 = vld [vmem:[#allocation10 + $0x50] sm:$0xff] }
 0x3a9   : > { %v1632_v43 = vsel %vm641_vm3, %v2724_v42, 0.0  ;;  %2498 = vmatprep.subr.mxu1 %v3025_v0  ;;  %v2726_v44 = vpop.eup %2725 }
 0x3aa   : > { %1633 = vadd.xlane.f32.xlu1 %v1632_v43  ;;  %v1466_v48 = vsel %vm641_vm3, %v2726_v44, 0.0  ;;  %v1925_v43 = vld [vmem:[#allocation10 + $0xe8] sm:$0xff] }
 0x3ab   : > { %2491 = vmatmul.mubr.msk.f32.vlgmr.msra.gmra.mrb[12].mxu1 %vm641_vm3, %v2726_v44  ;;  %v2551_v44 = vpack.c.bf16 %v1907_v41, %v1906_v40 }
 0x3ac   : > { %v2728_v45 = vpop.eup %2727  ;;  %2499 = vmatpush3.msra.mxu1 %v3423_v8  ;;  %2500 = vmatprep.mubr.msk.f32.mxu1 %vm3027_vm2, %v3025_v0  ;;  %v1944_v8 = vld [vmem:[#allocation10 + $0x180] sm:$0xff] }
 0x3ad   : > { %v1794_v46 = vsel %vm641_vm3, %v2728_v45, 0.0  ;;  %2508 = vmatprep.subr.mxu1 %v3025_v0  ;;  %v2561_v10 = vpack.c.bf16 %v1945_v9, %v1944_v8  ;;  %v1937_v8 = vld [vmem:[#allocation10 + $0x148] sm:$0xff] }
 0x3ae   : > { %1795 = vadd.xlane.f32.xlu0 %v1794_v46  ;;  %v1908_v46 = vld [vmem:[#allocation10 + $0x60] sm:$0xff]  ;;  %v2579_v9 = vpack.c.bf16 %v1937_v8, %v1936_v7 }
 0x3af   : > { %2501 = vmatmul.mubr.msk.f32.vlgmr.msra.gmra.mrb[14].mxu1 %vm641_vm3, %v2724_v42  ;;  %v1924_v42 = vld [vmem:[#allocation10 + $0xe0] sm:$0xff] }
 0x3b0   : > { %2509 = vmatpush3.msra.mxu1 %v1799_v47  ;;  %2510 = vmatprep.mubr.msk.f32.mxu1 %vm3027_vm2, %v3025_v0  ;;  %v1897_v0 = vld [vmem:[#allocation10 + $0x8] sm:$0xff] }
 0x3b1   : > { %v2531_v59 = vpack.c.bf16 %v1897_v0, %v1896_v55  ;;  %2562 = vmatprep.subr.bf16.mxu1 %v2561_v10  ;;  %v1909_v47 = vld [vmem:[#allocation10 + $0x68] sm:$0xff]  ;;  %v1926_v55 = vld [vmem:[#allocation10 + $0xf0] sm:$0xff] }
 0x3b2   : > { %1467 = vadd.xlane.f32.xlu0 %v1466_v48  ;;  %v2555_v48 = vpack.c.bf16 %v1909_v47, %v1908_v46  ;;  %v1950_v0 = vld [vmem:[#allocation10 + $0x1b0] sm:$0xff]  ;;  %v2557_v58 = vpack.c.bf16 %v1927_v56, %v1926_v55 }
 0x3b3   : > { %2511 = vmatmul.mubr.msk.f32.vlgmr.msra.gmra.mrb[16].mxu1 %vm641_vm3, %v2728_v45  ;;  %2532 = vmatpush3.bf16.msra.mxu0 %v2531_v59  ;;  %v2553_v45 = vpack.c.bf16 %v1925_v43, %v1924_v42  ;;  %v1951_v59 = vld [vmem:[#allocation10 + $0x1b8] sm:$0xff]  ;;  %v1954_v10 = vld [vmem:[#allocation10 + $0x1d0] sm:$0xff] }
 0x3b4   : > { %2534 = vmatprep.subr.bf16.mxu0 %v2533_v60  ;;  %2564 = vmatpush3.bf16.msra.mxu1 %v2563_v15  ;;  %v1910_v60 = vld [vmem:[#allocation10 + $0x70] sm:$0xff]  ;;  %v2573_v62 = vpack.c.bf16 %v1951_v59, %v1950_v0  ;;  %v2581_v14 = vpack.c.bf16 %v1955_v11, %v1954_v10  ;;  %v1939_v15 = vld [vmem:[#allocation10 + $0x158] sm:$0xff]  ;;  %v2324_v11 = vld [vmem:[#allocation11] ss:$0 sm:$0xff] }
 0x3b5   : > { %2566 = vmatprep.subr.bf16.mxu1 %v2565_v22  ;;  %v2559_v63 = vpack.c.bf16 %v1911_v61, %v1910_v60  ;;  %v2583_v19 = vpack.c.bf16 %v1939_v15, %v1938_v12 }
 0x3b6   : > { %649 = vadd.xlane.f32.xlu0 %v648_v49 }
 0x3b7   : > { %2536 = vmatpush3.bf16.msra.mxu0 %v2535_v2  ;;  %v1935_v2 = vld [vmem:[#allocation10 + $0x138] sm:$0xff] }
 0x3b8   : > { %2538 = vmatprep.subr.bf16.mxu0 %v2537_v3  ;;  %2568 = vmatpush3.bf16.msra.mxu1 %v2567_v25  ;;  %v2575_v3 = vpack.c.bf16 %v1935_v2, %v1934_v1 }
 0x3b9   : > { %2570 = vmatprep.subr.bf16.mxu1 %v2569_v29 }
 0x3ba   : > { %1305 = vadd.xlane.f32.xlu0 %v1304_v50 }
 0x3bb   : > { %2540 = vmatpush3.bf16.msra.mxu0 %v2539_v13 }
 0x3bc   : > { %2542 = vmatprep.subr.bf16.mxu0 %v2541_v17  ;;  %2572 = vmatpush3.bf16.msra.mxu1 %v2571_v37  ;;  %v1957_v17 = vld [vmem:[#allocation10 + $0x1e8] sm:$0xff]  ;;  %v1943_v37 = vld [vmem:[#allocation10 + $0x178] sm:$0xff] }
 0x3bd   : > { %2574 = vmatprep.subr.bf16.mxu1 %v2573_v62  ;;  %v2585_v22 = vpack.c.bf16 %v1957_v17, %v1956_v16 }
 0x3bf   : > { %2544 = vmatpush3.bf16.msra.mxu0 %v2543_v28 }
 0x3c0   : > { %2546 = vmatprep.subr.bf16.mxu0 %v2545_v31  ;;  %2576 = vmatpush3.bf16.msra.mxu1 %v2575_v3 }
 0x3c1   : > { %2578 = vmatprep.subr.bf16.mxu1 %v2577_v6 }
 0x3c3   : > { %2548 = vmatpush3.bf16.msra.mxu0 %v2547_v38 }
 0x3c4   : > { %2550 = vmatprep.subr.bf16.mxu0 %v2549_v39  ;;  %2580 = vmatpush3.bf16.msra.mxu1 %v2579_v9  ;;  %v2591_v39 = vpack.c.bf16 %v1943_v37, %v1942_v36 }
 0x3c5   : > { %2582 = vmatprep.subr.bf16.mxu1 %v2581_v14 }
 0x3c7   : > { %2552 = vmatpush3.bf16.msra.mxu0 %v2551_v44 }
 0x3c8   : > { %2554 = vmatprep.subr.bf16.mxu0 %v2553_v45  ;;  %2584 = vmatpush3.bf16.msra.mxu1 %v2583_v19 }
 0x3c9   : > { %2586 = vmatprep.subr.bf16.mxu1 %v2585_v22 }
 0x3cb   : > { %2556 = vmatpush3.bf16.msra.mxu0 %v2555_v48 }
 0x3cc   : > { %2558 = vmatprep.subr.bf16.mxu0 %v2557_v58  ;;  %2588 = vmatpush3.bf16.msra.mxu1 %v2587_v30 }
 0x3cd   : > { %2590 = vmatprep.subr.bf16.mxu1 %v2589_v35 }
 0x3cf   : > { %2560 = vmatpush3.bf16.msra.mxu0 %v2559_v63 }
 0x3d0   : > { %2592 = vmatpush3.bf16.msra.mxu1 %v2591_v39 }
 0x3f5   : > { %v3470_v51 = vpop.f32.mrb[2].mxu1 }
 0x3f6   : > { %v2442_v52 = vpop.f32.mrb[3].mxu1 }
 0x423   : > { %v812_v49 = vpop.xlane.xlu1 %811 }
 0x424   : > { %2729 = vrcp.f32 %v812_v49 }
 0x42b   : > { %v1140_v52 = vpop.xlane.xlu0 %1139 }
 0x42c   : > { %2731 = vrcp.f32 %v1140_v52  ;;  %v978_v52 = vpop.xlane.xlu1 %977 }
 0x42e   : > { %v2730_v18 = vpop.eup %2729 }
 0x436   : > { %v2732_v20 = vpop.eup %2731 }
 0x43b   : > { %v1796_v13 = vpop.xlane.xlu0 %1795 }
 0x43c   : > { %2733 = vrcp.f32 %v1796_v13 }
 0x43f   : > { %v1468_v28 = vpop.xlane.xlu0 %1467 }
 0x440   : > { %2735 = vrcp.f32 %v1468_v28 }
 0x446   : > { %v2734_v43 = vpop.eup %2733 }
 0x44a   : > { %v2736_v44 = vpop.eup %2735 }
 0x468   : > { %v886_v50 = vpop.f32.mrb[4].mxu1 }
 0x469   : > { %v2452_v53 = vpop.f32.mrb[5].mxu1  ;;  %v891_v25 = vmul.f32 %v2730_v18, %v886_v50  ;;  %v650_v50 = vpop.xlane.xlu0 %649 }
 0x46a   : > { %2737 = vrcp.f32 %v650_v50  ;;  %v1634_v53 = vpop.xlane.xlu1 %1633 }
 0x46b   : > { %2739 = vrcp.f32 %v978_v52 }
 0x46c   : > { %v3472_v54 = vpop.f32.mrb[6].mxu1  ;;  %2741 = vrcp.f32 %v1634_v53 }
 0x46d   : > { %v2462_v57 = vpop.f32.mrb[7].mxu1  ;;  %v1306_v61 = vpop.xlane.xlu0 %1305 }
 0x46e   : > { %2743 = vrcp.f32 %v1306_v61 }
 0x474   : > { %v2738_v55 = vpop.eup %2737 }
 0x475   : > { %v2740_v56 = vpop.eup %2739  ;;  %v725_v60 = vmul.f32 %v2738_v55, %v3470_v51 }
 0x476   : > { %v1214_v21 = vpop.f32.mrb[8].mxu1  ;;  %v1053_v57 = vmul.f32 %v2740_v56, %v3472_v54  ;;  %v2742_v1 = vpop.eup %2741 }
 0x477   : > { %v1219_v26 = vmul.f32 %v2732_v20, %v1214_v21  ;;  %v2472_v27 = vpop.f32.mrb[9].mxu1 }
 0x478   : > { %v2744_v2 = vpop.eup %2743 }
 0x479   : > { %v2703_v29 = vpack.i.bf16 %v891_v25, %v1219_v26 }
 0x47a   : > { %v1376_v31 = vpop.f32.mrb[10].mxu1 }
 0x47b   : > { %v2482_v32 = vpop.f32.mrb[11].mxu1  ;;  %2704 = vrot.lane.b32.xlu1 %v2703_v29, %s3026_s27  ;;  %v1381_v4 = vmul.f32 %v2744_v2, %v1376_v31 }
 0x47e   : > { %v1542_v38 = vpop.f32.mrb[12].mxu1 }
 0x47f   : > { %v2492_v40 = vpop.f32.mrb[13].mxu1  ;;  %v1547_v46 = vmul.f32 %v2736_v44, %v1542_v38 }
 0x482   : > { %v1704_v41 = vpop.f32.mrb[14].mxu1 }
 0x483   : > { %v2502_v42 = vpop.f32.mrb[15].mxu1  ;;  %v1709_v54 = vmul.f32 %v2742_v1, %v1704_v41 }
 0x486   : > { %v1870_v45 = vpop.f32.mrb[16].mxu1 }
 0x487   : > { %v1875_v47 = vmul.f32 %v2734_v43, %v1870_v45  ;;  %v2512_v48 = vpop.f32.mrb[17].mxu1 }
 0x489   : > { %v2708_v49 = vpack.i.bf16 %v1547_v46, %v1875_v47 }
 0x48b   : > { %2709 = vrot.lane.b32.xlu0 %v2708_v49, %s3026_s27 }
 0x4ed   : > { %v2705_v0 = vpop.permute.xlu1 %2704 }
 0x4ee   : > { %v2707_v58 = vunpack.i.h.bf16 %v2705_v0  ;;  %v2706_v59 = vunpack.i.l.bf16 %v2705_v0 }
 0x4f0   : > { %v1893_v62 = vsel %vm564_vm1, %v1053_v57, %v2706_v59  ;;  %v1892_v63 = vsel %vm564_vm1, %v725_v60, %v2707_v58 }
 0x4f1   : > { %2031 = vmatprep.mubr.f32.mxu0 %v1893_v62 }
 0x4f2   : > { %2032 = vmatmul.mubr.f32.vlgmr.msra.gmra.mrb[18].mxu0 %v1892_v63 }
 0x4fd   : > { %v2710_v3 = vpop.permute.xlu0 %2709 }
 0x4fe   : > { %v2712_v5 = vunpack.i.h.bf16 %v2710_v3  ;;  %v2711_v6 = vunpack.i.l.bf16 %v2710_v3 }
 0x500   : > { %v1895_v51 = vsel %vm564_vm1, %v1709_v54, %v2711_v6  ;;  %v1894_v7 = vsel %vm564_vm1, %v1381_v4, %v2712_v5 }
 0x501   : > { %2101 = vmatprep.mubr.f32.mxu1 %v1895_v51 }
 0x502   : > { %2102 = vmatmul.mubr.f32.vlgmr.msra.gmra.mrb[18].mxu1 %v1894_v7 }
 0x5c5   : > { %v2395_v8 = vpop.f32.mrb[18].mxu0 }
 0x5c6   : > { %v2396_v9 = vpop.f32.mrb[19].mxu0 }
 0x5c7   : > { %v2397_v10 = vadd.f32 %v2396_v9, %v2395_v8 }
 0x5c9   : > { %v2034_v14 = vadd.f32 %v2397_v10, %v2324_v11 }
 0x5d5   : > { %v2430_v12 = vpop.f32.mrb[18].mxu1 }
 0x5d6   : > { %v2431_v13 = vpop.f32.mrb[19].mxu1 }
 0x5d7   : > { %v2432_v15 = vadd.f32 %v2431_v13, %v2430_v12 }
 0x5d9   : > { %v2104_v16 = vadd.f32 %v2432_v15, %v2034_v14 }
 0x5db   : > { %2107 = vst.msk [vmem:[%s398_s24] sm:$0xff] %vm416_vm0, %v2104_v16 }
 0x5dc   : > { %2932 = shalt.err (!%p2929_p12)
}
 0x5dd   : > { %s2933_s12 = scalar_lea.hbm %s3488_s3, 128  ;;  %s2937_s13 = scalar_lea.hbm %s3604_s16, 256 }
 0x5de   : > { %p2934_p8 = scmp.ne.s32.totalorder %s3488_s3, %s2933_s12  ;;  %p2938_p5 = scmp.lt.u32.totalorder %s3488_s3, %s3604_s16 }
 0x5df   : > { %p2939_p9 = scmp.lt.u32.totalorder %s2937_s13, %s2933_s12  ;;  %p2941_p4 = scmp.lt.u32.totalorder %s2933_s12, %s3488_s3 }
 0x5e0   : > { %p2935_p13 = pnand %p2934_p8, %p3605_p7 }
 0x5e1   : > { %p2940_p2 = por %p2939_p9, %p2938_p5 }
 0x5e2   : > { %p2936_p3 = pneg %p2935_p13 }
 0x5e3   : > { %p2942_p11 = por %p2941_p4, %p2940_p2 }
 0x5e5   : > { %p2943_p10 = pnand %p2942_p11, %p2936_p3 }
 0x5e7   : > { %2946 = shalt.err (!%p2943_p10)
}
 0x5e8   : > { %2611 = dma.vmem_to_hbm [thread:$0]  (%p3605_p7), %s3490_s17, 128, %s3488_s3, %s2109_s28  }
 0x5e9 PF: > { %s3606_s20 = sld [smem:[#allocation19_spill]]  ;;  %s3607_s14 = sld [smem:[#allocation23_spill]] }
 0x5ea   : > { %s3608_s19 = sld [smem:[#allocation22_spill]] }
 0x5ef   : > { %s2135_s27 = sand.u32 1, %s3606_s20   ;;  %p3609_p1 = scmp.ne.s32.totalorder %s3607_s14, 0 }
 0x5f0   : > { %p3610_p6 = scmp.ge.s32.totalorder %s3608_s19, 2  ;;  %s2136_s29 = scalar_lea.sflag [#allocation4], %s2135_s27 }
 0x5f2   : > { %p2634_p0 = pnand %p3610_p6, %p3609_p1 }
 0x5f4   : > { %2988 = dma.done.wait (!%p2634_p0), %s2136_s29, 128  }
 0x5f5   : > { %2990 = vsyncadd (!%p2634_p0), %s2136_s29, 4294967168  ;;  %s27_s26 = sadd.s32 1, %s3608_s19   ;;  %s3611_s24 = sld [smem:[#allocation20_spill]] }
 0x5f6   : > { %p24_p12 = scmp.ge.s32.totalorder %s27_s26, 4   ;;  %s3612_s23 = sld [smem:[#allocation26_spill]] }
 0x5f7   : > { %s3613_s18 = sld [smem:[#allocation24_spill]]  ;;  %s3614_s21 = smov %s2997_s22 }
 0x5f8   :  { %26 = sbr.rel (!%p24_p12) target bundleno = 14 (0xe), region = 125 }
 0x5fb   : > { %s3615_s22 = smov %s3611_s24  ;;  %s3616_s24 = smov %s3009_s25 }
 0x5fd   : > { %s3617_s25 = smov %s3613_s18 }
 0x5ff   :  { %2141 = vsyncpa [#allocation3], 1 }
 0x600   :  { %2143 = vsyncpa [#allocation3 + $0x1], 1 }
 0x601   :  { %2144 = vsyncpa [#allocation6], 1 }
 0x602   :  { %2146 = vsyncpa [#allocation6 + $0x1], 1 }
 0x603   :  { %2147 = vsyncpa [#allocation9], 1 }
 0x604   :  { %2148 = vsyncpa [#allocation12], 1 }
 0x605   :  { %2149 = vsyncpa [#allocation4], 1 }
 0x606   :  { %2151 = vsyncpa [#allocation4 + $0x1], 1 }

</bundles_post_ra>
